<compile_context>
chip_gen: v7x
topology: tpu7x:2x2x1
jax: 0.10.0
libtpu: 0.0.40
codegen_flags: <defaults>
</compile_context>

<pallas_src>
import functools

import jax
import jax.numpy as jnp
from jax import lax
from jax.experimental import pallas as pl
from jax.experimental.pallas import tpu as pltpu


def _round_up(x, m):
    return (x + m - 1) // m * m


_PHASES = ((0, 0), (0, 1), (1, 0), (1, 1))          # (ry, rx); phase id p = 2*ry + rx


def _phase_taps(ry, rx):
    # the 4 taps (ty, tx) of the 3x3 padded-h window that feed output phase (ry, rx)
    return ((ry, rx), (ry, rx + 1), (ry + 1, rx), (ry + 1, rx + 1))


def _vmem_limit_bytes():
    # generation-aware scoped-VMEM limit: v5e/v6e have 128 MiB physical, v7x only 64.
    try:
        kind = jax.devices()[0].device_kind.lower()
    except Exception:  # pragma: no cover
        kind = ""
    if "v5" in kind or "v6" in kind:
        return 64 * 1024 * 1024
    return 48 * 1024 * 1024


# ---------------------------------------------------------------------------
# Fused kernel: down conv (GEMM) -> ReLU -> up transposed conv (16 dense dots)
# h is staged only in a VMEM scratch; one image per grid step.
# ---------------------------------------------------------------------------
def _unet_block_kernel(meta_ref, a_ref, wd_ref, bd_ref, wu_ref, bu_ref, y_ref,
                       h_scr, *, Wo, m_rows, guard, inner_p, outer_p):
    col = meta_ref[...]                       # [m_rows, 1] int32: wo index; <0 for pad rows
    row_valid = col >= 0

    # ---------------- down path: h = ReLU(Conv2d(LeakyReLU(x))) ----------------
    h = jnp.dot(a_ref[...], wd_ref[...], preferred_element_type=jnp.float32)
    h = jnp.maximum(h + bd_ref[...], 0.0)     # bias + the up path's ReLU, fused here
    h = jnp.where(row_valid, h, 0.0)          # zero the per-image row padding

    # stage h in VMEM with zeroed guard rows above/below; h never goes to HBM
    zeros_g = jnp.zeros((guard, inner_p), jnp.float32)
    h_scr[0:guard, :] = zeros_g
    h_scr[guard + m_rows:2 * guard + m_rows, :] = zeros_g
    h_scr[guard:guard + m_rows, :] = h

    # ------------- up path: ConvTranspose2d via 9 shifted views of h -----------
    # tap (ty, tx) of the zero-padded h:  hp[m+ty, l+tx, :] ==
    #   h_scr[guard + (ty-1)*Wo + (tx-1) + row, :], masked on the wo wrap-around
    #   (the vertical out-of-range cases land in the zero guard / padded rows).
    taps = {}
    for ty in range(3):
        for tx in range(3):
            shift = (ty - 1) * Wo + (tx - 1)
            t = h_scr[guard + shift:guard + shift + m_rows, :]
            ok = jnp.logical_and(col + (tx - 1) >= 0, col + (tx - 1) < Wo)
            taps[(ty, tx)] = jnp.where(ok, t, 0.0).astype(jnp.bfloat16)

    # 4 output phases x 4 valid taps = 16 dense MXU dots (no structural zeros)
    for p, (ry, rx) in enumerate(_PHASES):
        acc = jnp.zeros((m_rows, outer_p), jnp.float32)
        for j, (ty, tx) in enumerate(_phase_taps(ry, rx)):
            w = wu_ref[(p * 4 + j) * inner_p:(p * 4 + j + 1) * inner_p, :]
            acc = acc + jnp.dot(taps[(ty, tx)], w,
                                preferred_element_type=jnp.float32)
        acc = acc + bu_ref[:, p * outer_p:(p + 1) * outer_p]
        y_ref[:, p * outer_p:(p + 1) * outer_p] = acc.astype(y_ref.dtype)


# ---------------------------------------------------------------------------
# Glue: NHWC im2col for the down conv (pure slice/stack/reshape; XLA-fused)
# ---------------------------------------------------------------------------
def _im2col_nhwc(xp, k, stride, Ho, Wo):
    """xp: [N, Hp, Wp, C] (already padded) -> [N, Ho*Wo, k*k*C], taps (kh, kw) major."""
    N, C = xp.shape[0], xp.shape[-1]
    cols = []
    for kh in range(k):
        for kw in range(k):
            cols.append(xp[:,
                           kh:kh + stride * (Ho - 1) + 1:stride,
                           kw:kw + stride * (Wo - 1) + 1:stride, :])
    p = jnp.stack(cols, axis=3)               # [N, Ho, Wo, k*k, C]
    return p.reshape(N, Ho * Wo, k * k * C)


# ---------------------------------------------------------------------------
# UnetSkipConnectionBlock forward (innermost, norm_layer=None)
# ---------------------------------------------------------------------------
def unet_skip_block_forward(x, params):
    Wd, bd = params["down_w"], params["down_b"]   # Conv2d        weight [inner, Cin, 4, 4]
    Wu, bu = params["up_w"], params["up_b"]       # ConvTranspose weight [inner, outer, 4, 4]

    N, Cin, H, W = x.shape
    inner_nc = Wd.shape[0]
    outer_nc = Wu.shape[1]
    Ho, Wo = H // 2, W // 2
    m_img = Ho * Wo
    m_rows = _round_up(m_img, 16)                 # bf16 sublane packing
    guard = max(16, _round_up(Wo + 1, 8))         # zero guard rows around h in VMEM
    inner_p = _round_up(inner_nc, 128)            # lane-dense channel widths
    outer_p = _round_up(outer_nc, 128)
    K1 = 16 * Cin

    # ---- host-side layout plumbing (reshape/pad only; no per-stage transposes) ----
    # single NCHW -> NHWC transpose; LeakyReLU(0.2) on the un-replicated x;
    # cast to bf16 BEFORE the 4x im2col replication (no f32 staging copy).
    x_nhwc = jnp.transpose(x, (0, 2, 3, 1))
    xr = jnp.where(x_nhwc > 0, x_nhwc, 0.2 * x_nhwc).astype(jnp.bfloat16)
    xp = jnp.pad(xr, ((0, 0), (1, 1), (1, 1), (0, 0)))
    a1 = _im2col_nhwc(xp, 4, 2, Ho, Wo)                        # [N, m_img, 16*Cin] bf16
    a1 = jnp.pad(a1, ((0, 0), (0, m_rows - m_img), (0, 0)))
    a1 = a1.reshape(N * m_rows, K1)

    # down-conv weight as a [16*Cin, inner_p] GEMM operand, (kh, kw, ci) -> oc
    wd2 = jnp.transpose(Wd, (2, 3, 1, 0)).reshape(K1, inner_nc)
    wd2 = jnp.pad(wd2, ((0, 0), (0, inner_p - inner_nc))).astype(jnp.bfloat16)
    bd2 = jnp.pad(bd, (0, inner_p - inner_nc)).reshape(1, inner_p).astype(jnp.float32)

    # up-conv weights packed per (phase, tap):
    #   y[2m+ry, 2l+rx, co] = sum_{(ty,tx) in phase taps, ci}
    #       hp[m+ty, l+tx, ci] * Wu[ci, co, 3+ry-2ty, 3+rx-2tx]
    blocks = []
    for (ry, rx) in _PHASES:
        for (ty, tx) in _phase_taps(ry, rx):
            blocks.append(Wu[:, :, 3 + ry - 2 * ty, 3 + rx - 2 * tx])   # [inner, outer]
    wu2 = jnp.stack(blocks, axis=0)                                     # [16, inner, outer]
    wu2 = jnp.pad(wu2, ((0, 0), (0, inner_p - inner_nc), (0, outer_p - outer_nc)))
    wu2 = wu2.astype(jnp.bfloat16).reshape(16 * inner_p, outer_p)
    bu2 = jnp.tile(jnp.pad(bu, (0, outer_p - outer_nc)).reshape(1, outer_p), (1, 4))
    bu2 = bu2.astype(jnp.float32)                                       # [1, 4*outer_p]

    # per-row metadata: wo index for valid rows, negative sentinel for padded rows
    rows = jnp.arange(m_rows, dtype=jnp.int32)
    meta = jnp.where(rows < m_img, rows % Wo, -(2 ** 20)).astype(jnp.int32)
    meta = meta.reshape(m_rows, 1)

    kernel = functools.partial(_unet_block_kernel, Wo=Wo, m_rows=m_rows,
                               guard=guard, inner_p=inner_p, outer_p=outer_p)
    y = pl.pallas_call(
        kernel,
        out_shape=jax.ShapeDtypeStruct((N * m_rows, 4 * outer_p), jnp.float32),
        grid_spec=pltpu.PrefetchScalarGridSpec(
            num_scalar_prefetch=0,
            grid=(N,),                                              # one image per step
            in_specs=[
                pl.BlockSpec((m_rows, 1), lambda i: (0, 0)),              # row meta
                pl.BlockSpec((m_rows, K1), lambda i: (i, 0)),             # im2col(x), bf16
                pl.BlockSpec((K1, inner_p), lambda i: (0, 0)),            # Wd
                pl.BlockSpec((1, inner_p), lambda i: (0, 0)),             # bd
                pl.BlockSpec((16 * inner_p, outer_p), lambda i: (0, 0)),  # Wu per (phase,tap)
                pl.BlockSpec((1, 4 * outer_p), lambda i: (0, 0)),         # bu per phase
            ],
            out_specs=pl.BlockSpec((m_rows, 4 * outer_p), lambda i: (i, 0)),
            scratch_shapes=[pltpu.VMEM((2 * guard + m_rows, inner_p), jnp.float32)],
        ),
        compiler_params=pltpu.CompilerParams(
            dimension_semantics=("parallel",),        # batch across cores (v7x megacore)
            vmem_limit_bytes=_vmem_limit_bytes(),
        ),
    )(meta, a1, wd2, bd2, wu2, bu2)

    # phase-grouped [N, Ho, Wo, ry, rx, co] -> NCHW y, concatenated with the raw (f32) skip
    y = y.reshape(N, m_rows, 4 * outer_p)[:, :m_img, :]
    y = y.reshape(N, Ho, Wo, 2, 2, outer_p)[..., :outer_nc]
    y_nchw = jnp.transpose(y, (0, 5, 1, 3, 2, 4)).reshape(N, outer_nc, H, W)
    # TODO(synk): when composing a full UNet from these blocks, keep the NHWC /
    # phase-grouped layout between blocks and hoist this transpose + concat to the
    # network boundary (saves one output-sized HBM round trip per block).
    return jnp.concatenate([x, y_nchw], axis=1)


# ---------------------------------------------------------------------------
# Pure-JAX reference (f32 XLA convs) for correctness check
# ---------------------------------------------------------------------------
def reference_forward(x, params):
    Wd, bd, Wu, bu = params["down_w"], params["down_b"], params["up_w"], params["up_b"]
    xr = jnp.where(x > 0, x, 0.2 * x)
    h = lax.conv_general_dilated(
        xr, Wd, window_strides=(2, 2), padding=((1, 1), (1, 1)),
        dimension_numbers=("NCHW", "OIHW", "NCHW")) + bd[None, :, None, None]
    hr = jnp.maximum(h, 0.0)
    Wc = jnp.transpose(Wu[:, :, ::-1, ::-1], (1, 0, 2, 3))
    y = lax.conv_general_dilated(
        hr, Wc, window_strides=(1, 1), padding=((2, 2), (2, 2)),
        lhs_dilation=(2, 2),
        dimension_numbers=("NCHW", "OIHW", "NCHW")) + bu[None, :, None, None]
    return jnp.concatenate([x, y], axis=1)


if __name__ == "__main__":
    # innermost block config: input_nc defaults to outer_nc
    N, Cin, H, W = 2, 4, 16, 16
    outer_nc, inner_nc = 4, 8

    key = jax.random.PRNGKey(0)
    k1, k2, k3, k4, k5 = jax.random.split(key, 5)
    x = jax.random.normal(k1, (N, Cin, H, W), jnp.float32)
    params = dict(
        down_w=0.1 * jax.random.normal(k2, (inner_nc, Cin, 4, 4), jnp.float32),
        down_b=0.1 * jax.random.normal(k3, (inner_nc,), jnp.float32),
        up_w=0.1 * jax.random.normal(k4, (inner_nc, outer_nc, 4, 4), jnp.float32),
        up_b=0.1 * jax.random.normal(k5, (outer_nc,), jnp.float32),
    )

    out = jax.jit(unet_skip_block_forward)(x, params)
    out = jax.block_until_ready(out)

    ref = reference_forward(x, params)
    assert out.shape == (N, Cin + outer_nc, H, W), out.shape
    # bf16 MXU operands with f32 accumulation -> tolerance loosened accordingly
    assert jnp.allclose(out, ref, atol=5e-2, rtol=5e-2), float(jnp.max(jnp.abs(out - ref)))

    print("KERNEL_OK")
</pallas_src>

<mosaic_0001>
module attributes {stable_mosaic.version = 11 : i64} {
  func.func @_unet_block_kernel(%arg0: i32, %arg1: memref<64x1xi32, #tpu.memory_space<vmem>>, %arg2: memref<64x64xbf16, #tpu.memory_space<vmem>>, %arg3: memref<64x128xbf16, #tpu.memory_space<vmem>>, %arg4: memref<1x128xf32, #tpu.memory_space<vmem>>, %arg5: memref<2048x128xbf16, #tpu.memory_space<vmem>>, %arg6: memref<1x512xf32, #tpu.memory_space<vmem>>, %arg7: memref<64x512xf32, #tpu.memory_space<vmem>>, %arg8: memref<96x128xf32, #tpu.memory_space<vmem>>) attributes {dimension_semantics = [#tpu.dimension_semantics<parallel>], iteration_bounds = array<i64: 2>, scalar_prefetch = 0 : i64, scratch_operands = 1 : i64, tpu.core_type = #tpu.core_type<tc>, window_params = [{pipeline_mode = #tpu.pipeline_mode<synchronous>, transform_indices = @transform_0, window_bounds = array<i64: 64, 1>}, {transform_indices = @transform_1, window_bounds = array<i64: 64, 64>}, {pipeline_mode = #tpu.pipeline_mode<synchronous>, transform_indices = @transform_2, window_bounds = array<i64: 64, 128>}, {pipeline_mode = #tpu.pipeline_mode<synchronous>, transform_indices = @transform_3, window_bounds = array<i64: 1, 128>}, {pipeline_mode = #tpu.pipeline_mode<synchronous>, transform_indices = @transform_4, window_bounds = array<i64: 2048, 128>}, {pipeline_mode = #tpu.pipeline_mode<synchronous>, transform_indices = @transform_5, window_bounds = array<i64: 1, 512>}, {transform_indices = @transform_6, window_bounds = array<i64: 64, 512>}]} {
    %c0 = arith.constant 0 : index
    %c0_0 = arith.constant 0 : index
    %0 = vector.load %arg1[%c0, %c0_0] : memref<64x1xi32, #tpu.memory_space<vmem>>, vector<64x1xi32>
    %c0_i32 = arith.constant 0 : i32
    %1 = vector.broadcast %c0_i32 : i32 to vector<64x1xi32>
    %2 = arith.cmpi sge, %0, %1 : vector<64x1xi32>
    %c0_1 = arith.constant 0 : index
    %c0_2 = arith.constant 0 : index
    %3 = vector.load %arg2[%c0_1, %c0_2] : memref<64x64xbf16, #tpu.memory_space<vmem>>, vector<64x64xbf16>
    %c0_3 = arith.constant 0 : index
    %c0_4 = arith.constant 0 : index
    %4 = vector.load %arg3[%c0_3, %c0_4] : memref<64x128xbf16, #tpu.memory_space<vmem>>, vector<64x128xbf16>
    %cst = arith.constant dense<0.000000e+00> : vector<64x128xf32>
    %5 = tpu.matmul %3, %4, %cst {dimension_numbers = #tpu.dot_dimension_numbers<[1], [0], [0], [1], [0, 0, 1, 1], [], []>} : vector<64x64xbf16>, vector<64x128xbf16>, vector<64x128xf32> -> vector<64x128xf32>
    %c0_5 = arith.constant 0 : index
    %c0_6 = arith.constant 0 : index
    %6 = vector.load %arg4[%c0_5, %c0_6] : memref<1x128xf32, #tpu.memory_space<vmem>>, vector<1x128xf32>
    %7 = vector.broadcast %6 : vector<1x128xf32> to vector<64x128xf32>
    %8 = arith.addf %5, %7 : vector<64x128xf32>
    %cst_7 = arith.constant 0.000000e+00 : f32
    %9 = vector.broadcast %cst_7 : f32 to vector<64x128xf32>
    %10 = arith.maximumf %8, %9 : vector<64x128xf32>
    %cst_8 = arith.constant 0.000000e+00 : f32
    %11 = vector.shape_cast %2 : vector<64x1xi1> to vector<64x1xi1>
    %12 = vector.broadcast %11 : vector<64x1xi1> to vector<64x128xi1>
    %13 = vector.broadcast %cst_8 : f32 to vector<64x128xf32>
    %14 = arith.select %12, %10, %13 : vector<64x128xi1>, vector<64x128xf32>
    %cst_9 = arith.constant 0.000000e+00 : f32
    %15 = vector.broadcast %cst_9 : f32 to vector<16x128xf32>
    %c0_10 = arith.constant 0 : index
    %c0_11 = arith.constant 0 : index
    %16 = vector.load %arg8[%c0_10, %c0_11] : memref<96x128xf32, #tpu.memory_space<vmem>>, vector<16x128xf32>
    tpu.vector_store %arg8[%c0_10, %c0_11], %15 {strides = array<i32>} : memref<96x128xf32, #tpu.memory_space<vmem>>, vector<16x128xf32>,
    %c80 = arith.constant 80 : index
    %c0_12 = arith.constant 0 : index
    %17 = vector.load %arg8[%c80, %c0_12] : memref<96x128xf32, #tpu.memory_space<vmem>>, vector<16x128xf32>
    tpu.vector_store %arg8[%c80, %c0_12], %15 {strides = array<i32>} : memref<96x128xf32, #tpu.memory_space<vmem>>, vector<16x128xf32>,
    %c16 = arith.constant 16 : index
    %c0_13 = arith.constant 0 : index
    %18 = vector.load %arg8[%c16, %c0_13] : memref<96x128xf32, #tpu.memory_space<vmem>>, vector<64x128xf32>
    tpu.vector_store %arg8[%c16, %c0_13], %14 {strides = array<i32>} : memref<96x128xf32, #tpu.memory_space<vmem>>, vector<64x128xf32>,
    %c7 = arith.constant 7 : index
    %c0_14 = arith.constant 0 : index
    %19 = vector.load %arg8[%c7, %c0_14] : memref<96x128xf32, #tpu.memory_space<vmem>>, vector<64x128xf32>
    %c-1_i32 = arith.constant -1 : i32
    %20 = vector.broadcast %c-1_i32 : i32 to vector<64x1xi32>
    %21 = arith.addi %0, %20 : vector<64x1xi32>
    %c0_i32_15 = arith.constant 0 : i32
    %22 = vector.broadcast %c0_i32_15 : i32 to vector<64x1xi32>
    %23 = arith.cmpi sge, %21, %22 : vector<64x1xi32>
    %c-1_i32_16 = arith.constant -1 : i32
    %24 = vector.broadcast %c-1_i32_16 : i32 to vector<64x1xi32>
    %25 = arith.addi %0, %24 : vector<64x1xi32>
    %c8_i32 = arith.constant 8 : i32
    %26 = vector.broadcast %c8_i32 : i32 to vector<64x1xi32>
    %27 = arith.cmpi slt, %25, %26 : vector<64x1xi32>
    %28 = arith.andi %23, %27 : vector<64x1xi1>
    %cst_17 = arith.constant 0.000000e+00 : f32
    %29 = vector.shape_cast %28 : vector<64x1xi1> to vector<64x1xi1>
    %30 = vector.broadcast %29 : vector<64x1xi1> to vector<64x128xi1>
    %31 = vector.broadcast %cst_17 : f32 to vector<64x128xf32>
    %32 = arith.select %30, %19, %31 : vector<64x128xi1>, vector<64x128xf32>
    %33 = arith.truncf %32 : vector<64x128xf32> to vector<64x128xbf16>
    %c8 = arith.constant 8 : index
    %c0_18 = arith.constant 0 : index
    %34 = vector.load %arg8[%c8, %c0_18] : memref<96x128xf32, #tpu.memory_space<vmem>>, vector<64x128xf32>
    %c0_i32_19 = arith.constant 0 : i32
    %35 = vector.broadcast %c0_i32_19 : i32 to vector<64x1xi32>
    %36 = arith.addi %0, %35 : vector<64x1xi32>
    %c0_i32_20 = arith.constant 0 : i32
    %37 = vector.broadcast %c0_i32_20 : i32 to vector<64x1xi32>
    %38 = arith.cmpi sge, %36, %37 : vector<64x1xi32>
    %c0_i32_21 = arith.constant 0 : i32
    %39 = vector.broadcast %c0_i32_21 : i32 to vector<64x1xi32>
    %40 = arith.addi %0, %39 : vector<64x1xi32>
    %c8_i32_22 = arith.constant 8 : i32
    %41 = vector.broadcast %c8_i32_22 : i32 to vector<64x1xi32>
    %42 = arith.cmpi slt, %40, %41 : vector<64x1xi32>
    %43 = arith.andi %38, %42 : vector<64x1xi1>
    %cst_23 = arith.constant 0.000000e+00 : f32
    %44 = vector.shape_cast %43 : vector<64x1xi1> to vector<64x1xi1>
    %45 = vector.broadcast %44 : vector<64x1xi1> to vector<64x128xi1>
    %46 = vector.broadcast %cst_23 : f32 to vector<64x128xf32>
    %47 = arith.select %45, %34, %46 : vector<64x128xi1>, vector<64x128xf32>
    %48 = arith.truncf %47 : vector<64x128xf32> to vector<64x128xbf16>
    %c9 = arith.constant 9 : index
    %c0_24 = arith.constant 0 : index
    %49 = vector.load %arg8[%c9, %c0_24] : memref<96x128xf32, #tpu.memory_space<vmem>>, vector<64x128xf32>
    %c1_i32 = arith.constant 1 : i32
    %50 = vector.broadcast %c1_i32 : i32 to vector<64x1xi32>
    %51 = arith.addi %0, %50 : vector<64x1xi32>
    %c0_i32_25 = arith.constant 0 : i32
    %52 = vector.broadcast %c0_i32_25 : i32 to vector<64x1xi32>
    %53 = arith.cmpi sge, %51, %52 : vector<64x1xi32>
    %c1_i32_26 = arith.constant 1 : i32
    %54 = vector.broadcast %c1_i32_26 : i32 to vector<64x1xi32>
    %55 = arith.addi %0, %54 : vector<64x1xi32>
    %c8_i32_27 = arith.constant 8 : i32
    %56 = vector.broadcast %c8_i32_27 : i32 to vector<64x1xi32>
    %57 = arith.cmpi slt, %55, %56 : vector<64x1xi32>
    %58 = arith.andi %53, %57 : vector<64x1xi1>
    %cst_28 = arith.constant 0.000000e+00 : f32
    %59 = vector.shape_cast %58 : vector<64x1xi1> to vector<64x1xi1>
    %60 = vector.broadcast %59 : vector<64x1xi1> to vector<64x128xi1>
    %61 = vector.broadcast %cst_28 : f32 to vector<64x128xf32>
    %62 = arith.select %60, %49, %61 : vector<64x128xi1>, vector<64x128xf32>
    %63 = arith.truncf %62 : vector<64x128xf32> to vector<64x128xbf16>
    %c15 = arith.constant 15 : index
    %c0_29 = arith.constant 0 : index
    %64 = vector.load %arg8[%c15, %c0_29] : memref<96x128xf32, #tpu.memory_space<vmem>>, vector<64x128xf32>
    %c-1_i32_30 = arith.constant -1 : i32
    %65 = vector.broadcast %c-1_i32_30 : i32 to vector<64x1xi32>
    %66 = arith.addi %0, %65 : vector<64x1xi32>
    %c0_i32_31 = arith.constant 0 : i32
    %67 = vector.broadcast %c0_i32_31 : i32 to vector<64x1xi32>
    %68 = arith.cmpi sge, %66, %67 : vector<64x1xi32>
    %c-1_i32_32 = arith.constant -1 : i32
    %69 = vector.broadcast %c-1_i32_32 : i32 to vector<64x1xi32>
    %70 = arith.addi %0, %69 : vector<64x1xi32>
    %c8_i32_33 = arith.constant 8 : i32
    %71 = vector.broadcast %c8_i32_33 : i32 to vector<64x1xi32>
    %72 = arith.cmpi slt, %70, %71 : vector<64x1xi32>
    %73 = arith.andi %68, %72 : vector<64x1xi1>
    %cst_34 = arith.constant 0.000000e+00 : f32
    %74 = vector.shape_cast %73 : vector<64x1xi1> to vector<64x1xi1>
    %75 = vector.broadcast %74 : vector<64x1xi1> to vector<64x128xi1>
    %76 = vector.broadcast %cst_34 : f32 to vector<64x128xf32>
    %77 = arith.select %75, %64, %76 : vector<64x128xi1>, vector<64x128xf32>
    %78 = arith.truncf %77 : vector<64x128xf32> to vector<64x128xbf16>
    %c16_35 = arith.constant 16 : index
    %c0_36 = arith.constant 0 : index
    %79 = vector.load %arg8[%c16_35, %c0_36] : memref<96x128xf32, #tpu.memory_space<vmem>>, vector<64x128xf32>
    %c0_i32_37 = arith.constant 0 : i32
    %80 = vector.broadcast %c0_i32_37 : i32 to vector<64x1xi32>
    %81 = arith.addi %0, %80 : vector<64x1xi32>
    %c0_i32_38 = arith.constant 0 : i32
    %82 = vector.broadcast %c0_i32_38 : i32 to vector<64x1xi32>
    %83 = arith.cmpi sge, %81, %82 : vector<64x1xi32>
    %c0_i32_39 = arith.constant 0 : i32
    %84 = vector.broadcast %c0_i32_39 : i32 to vector<64x1xi32>
    %85 = arith.addi %0, %84 : vector<64x1xi32>
    %c8_i32_40 = arith.constant 8 : i32
    %86 = vector.broadcast %c8_i32_40 : i32 to vector<64x1xi32>
    %87 = arith.cmpi slt, %85, %86 : vector<64x1xi32>
    %88 = arith.andi %83, %87 : vector<64x1xi1>
    %cst_41 = arith.constant 0.000000e+00 : f32
    %89 = vector.shape_cast %88 : vector<64x1xi1> to vector<64x1xi1>
    %90 = vector.broadcast %89 : vector<64x1xi1> to vector<64x128xi1>
    %91 = vector.broadcast %cst_41 : f32 to vector<64x128xf32>
    %92 = arith.select %90, %79, %91 : vector<64x128xi1>, vector<64x128xf32>
    %93 = arith.truncf %92 : vector<64x128xf32> to vector<64x128xbf16>
    %c17 = arith.constant 17 : index
    %c0_42 = arith.constant 0 : index
    %94 = vector.load %arg8[%c17, %c0_42] : memref<96x128xf32, #tpu.memory_space<vmem>>, vector<64x128xf32>
    %c1_i32_43 = arith.constant 1 : i32
    %95 = vector.broadcast %c1_i32_43 : i32 to vector<64x1xi32>
    %96 = arith.addi %0, %95 : vector<64x1xi32>
    %c0_i32_44 = arith.constant 0 : i32
    %97 = vector.broadcast %c0_i32_44 : i32 to vector<64x1xi32>
    %98 = arith.cmpi sge, %96, %97 : vector<64x1xi32>
    %c1_i32_45 = arith.constant 1 : i32
    %99 = vector.broadcast %c1_i32_45 : i32 to vector<64x1xi32>
    %100 = arith.addi %0, %99 : vector<64x1xi32>
    %c8_i32_46 = arith.constant 8 : i32
    %101 = vector.broadcast %c8_i32_46 : i32 to vector<64x1xi32>
    %102 = arith.cmpi slt, %100, %101 : vector<64x1xi32>
    %103 = arith.andi %98, %102 : vector<64x1xi1>
    %cst_47 = arith.constant 0.000000e+00 : f32
    %104 = vector.shape_cast %103 : vector<64x1xi1> to vector<64x1xi1>
    %105 = vector.broadcast %104 : vector<64x1xi1> to vector<64x128xi1>
    %106 = vector.broadcast %cst_47 : f32 to vector<64x128xf32>
    %107 = arith.select %105, %94, %106 : vector<64x128xi1>, vector<64x128xf32>
    %108 = arith.truncf %107 : vector<64x128xf32> to vector<64x128xbf16>
    %c23 = arith.constant 23 : index
    %c0_48 = arith.constant 0 : index
    %109 = vector.load %arg8[%c23, %c0_48] : memref<96x128xf32, #tpu.memory_space<vmem>>, vector<64x128xf32>
    %c-1_i32_49 = arith.constant -1 : i32
    %110 = vector.broadcast %c-1_i32_49 : i32 to vector<64x1xi32>
    %111 = arith.addi %0, %110 : vector<64x1xi32>
    %c0_i32_50 = arith.constant 0 : i32
    %112 = vector.broadcast %c0_i32_50 : i32 to vector<64x1xi32>
    %113 = arith.cmpi sge, %111, %112 : vector<64x1xi32>
    %c-1_i32_51 = arith.constant -1 : i32
    %114 = vector.broadcast %c-1_i32_51 : i32 to vector<64x1xi32>
    %115 = arith.addi %0, %114 : vector<64x1xi32>
    %c8_i32_52 = arith.constant 8 : i32
    %116 = vector.broadcast %c8_i32_52 : i32 to vector<64x1xi32>
    %117 = arith.cmpi slt, %115, %116 : vector<64x1xi32>
    %118 = arith.andi %113, %117 : vector<64x1xi1>
    %cst_53 = arith.constant 0.000000e+00 : f32
    %119 = vector.shape_cast %118 : vector<64x1xi1> to vector<64x1xi1>
    %120 = vector.broadcast %119 : vector<64x1xi1> to vector<64x128xi1>
    %121 = vector.broadcast %cst_53 : f32 to vector<64x128xf32>
    %122 = arith.select %120, %109, %121 : vector<64x128xi1>, vector<64x128xf32>
    %123 = arith.truncf %122 : vector<64x128xf32> to vector<64x128xbf16>
    %c24 = arith.constant 24 : index
    %c0_54 = arith.constant 0 : index
    %124 = vector.load %arg8[%c24, %c0_54] : memref<96x128xf32, #tpu.memory_space<vmem>>, vector<64x128xf32>
    %c0_i32_55 = arith.constant 0 : i32
    %125 = vector.broadcast %c0_i32_55 : i32 to vector<64x1xi32>
    %126 = arith.addi %0, %125 : vector<64x1xi32>
    %c0_i32_56 = arith.constant 0 : i32
    %127 = vector.broadcast %c0_i32_56 : i32 to vector<64x1xi32>
    %128 = arith.cmpi sge, %126, %127 : vector<64x1xi32>
    %c0_i32_57 = arith.constant 0 : i32
    %129 = vector.broadcast %c0_i32_57 : i32 to vector<64x1xi32>
    %130 = arith.addi %0, %129 : vector<64x1xi32>
    %c8_i32_58 = arith.constant 8 : i32
    %131 = vector.broadcast %c8_i32_58 : i32 to vector<64x1xi32>
    %132 = arith.cmpi slt, %130, %131 : vector<64x1xi32>
    %133 = arith.andi %128, %132 : vector<64x1xi1>
    %cst_59 = arith.constant 0.000000e+00 : f32
    %134 = vector.shape_cast %133 : vector<64x1xi1> to vector<64x1xi1>
    %135 = vector.broadcast %134 : vector<64x1xi1> to vector<64x128xi1>
    %136 = vector.broadcast %cst_59 : f32 to vector<64x128xf32>
    %137 = arith.select %135, %124, %136 : vector<64x128xi1>, vector<64x128xf32>
    %138 = arith.truncf %137 : vector<64x128xf32> to vector<64x128xbf16>
    %c25 = arith.constant 25 : index
    %c0_60 = arith.constant 0 : index
    %139 = vector.load %arg8[%c25, %c0_60] : memref<96x128xf32, #tpu.memory_space<vmem>>, vector<64x128xf32>
    %c1_i32_61 = arith.constant 1 : i32
    %140 = vector.broadcast %c1_i32_61 : i32 to vector<64x1xi32>
    %141 = arith.addi %0, %140 : vector<64x1xi32>
    %c0_i32_62 = arith.constant 0 : i32
    %142 = vector.broadcast %c0_i32_62 : i32 to vector<64x1xi32>
    %143 = arith.cmpi sge, %141, %142 : vector<64x1xi32>
    %c1_i32_63 = arith.constant 1 : i32
    %144 = vector.broadcast %c1_i32_63 : i32 to vector<64x1xi32>
    %145 = arith.addi %0, %144 : vector<64x1xi32>
    %c8_i32_64 = arith.constant 8 : i32
    %146 = vector.broadcast %c8_i32_64 : i32 to vector<64x1xi32>
    %147 = arith.cmpi slt, %145, %146 : vector<64x1xi32>
    %148 = arith.andi %143, %147 : vector<64x1xi1>
    %cst_65 = arith.constant 0.000000e+00 : f32
    %149 = vector.shape_cast %148 : vector<64x1xi1> to vector<64x1xi1>
    %150 = vector.broadcast %149 : vector<64x1xi1> to vector<64x128xi1>
    %151 = vector.broadcast %cst_65 : f32 to vector<64x128xf32>
    %152 = arith.select %150, %139, %151 : vector<64x128xi1>, vector<64x128xf32>
    %153 = arith.truncf %152 : vector<64x128xf32> to vector<64x128xbf16>
    %cst_66 = arith.constant 0.000000e+00 : f32
    %154 = vector.broadcast %cst_66 : f32 to vector<64x128xf32>
    %c0_67 = arith.constant 0 : index
    %c0_68 = arith.constant 0 : index
    %155 = vector.load %arg5[%c0_67, %c0_68] : memref<2048x128xbf16, #tpu.memory_space<vmem>>, vector<128x128xbf16>
    %cst_69 = arith.constant dense<0.000000e+00> : vector<64x128xf32>
    %156 = tpu.matmul %33, %155, %cst_69 {dimension_numbers = #tpu.dot_dimension_numbers<[1], [0], [0], [1], [0, 0, 1, 1], [], []>} : vector<64x128xbf16>, vector<128x128xbf16>, vector<64x128xf32> -> vector<64x128xf32>
    %157 = arith.addf %154, %156 : vector<64x128xf32>
    %c128 = arith.constant 128 : index
    %c0_70 = arith.constant 0 : index
    %158 = vector.load %arg5[%c128, %c0_70] : memref<2048x128xbf16, #tpu.memory_space<vmem>>, vector<128x128xbf16>
    %cst_71 = arith.constant dense<0.000000e+00> : vector<64x128xf32>
    %159 = tpu.matmul %48, %158, %cst_71 {dimension_numbers = #tpu.dot_dimension_numbers<[1], [0], [0], [1], [0, 0, 1, 1], [], []>} : vector<64x128xbf16>, vector<128x128xbf16>, vector<64x128xf32> -> vector<64x128xf32>
    %160 = arith.addf %157, %159 : vector<64x128xf32>
    %c256 = arith.constant 256 : index
    %c0_72 = arith.constant 0 : index
    %161 = vector.load %arg5[%c256, %c0_72] : memref<2048x128xbf16, #tpu.memory_space<vmem>>, vector<128x128xbf16>
    %cst_73 = arith.constant dense<0.000000e+00> : vector<64x128xf32>
    %162 = tpu.matmul %78, %161, %cst_73 {dimension_numbers = #tpu.dot_dimension_numbers<[1], [0], [0], [1], [0, 0, 1, 1], [], []>} : vector<64x128xbf16>, vector<128x128xbf16>, vector<64x128xf32> -> vector<64x128xf32>
    %163 = arith.addf %160, %162 : vector<64x128xf32>
    %c384 = arith.constant 384 : index
    %c0_74 = arith.constant 0 : index
    %164 = vector.load %arg5[%c384, %c0_74] : memref<2048x128xbf16, #tpu.memory_space<vmem>>, vector<128x128xbf16>
    %cst_75 = arith.constant dense<0.000000e+00> : vector<64x128xf32>
    %165 = tpu.matmul %93, %164, %cst_75 {dimension_numbers = #tpu.dot_dimension_numbers<[1], [0], [0], [1], [0, 0, 1, 1], [], []>} : vector<64x128xbf16>, vector<128x128xbf16>, vector<64x128xf32> -> vector<64x128xf32>
    %166 = arith.addf %163, %165 : vector<64x128xf32>
    %c0_76 = arith.constant 0 : index
    %c0_77 = arith.constant 0 : index
    %167 = vector.load %arg6[%c0_76, %c0_77] : memref<1x512xf32, #tpu.memory_space<vmem>>, vector<1x128xf32>
    %168 = vector.broadcast %167 : vector<1x128xf32> to vector<64x128xf32>
    %169 = arith.addf %166, %168 : vector<64x128xf32>
    %c0_78 = arith.constant 0 : index
    %c0_79 = arith.constant 0 : index
    %170 = vector.load %arg7[%c0_78, %c0_79] : memref<64x512xf32, #tpu.memory_space<vmem>>, vector<64x128xf32>
    tpu.vector_store %arg7[%c0_78, %c0_79], %169 {strides = array<i32>} : memref<64x512xf32, #tpu.memory_space<vmem>>, vector<64x128xf32>,
    %cst_80 = arith.constant 0.000000e+00 : f32
    %171 = vector.broadcast %cst_80 : f32 to vector<64x128xf32>
    %c512 = arith.constant 512 : index
    %c0_81 = arith.constant 0 : index
    %172 = vector.load %arg5[%c512, %c0_81] : memref<2048x128xbf16, #tpu.memory_space<vmem>>, vector<128x128xbf16>
    %cst_82 = arith.constant dense<0.000000e+00> : vector<64x128xf32>
    %173 = tpu.matmul %48, %172, %cst_82 {dimension_numbers = #tpu.dot_dimension_numbers<[1], [0], [0], [1], [0, 0, 1, 1], [], []>} : vector<64x128xbf16>, vector<128x128xbf16>, vector<64x128xf32> -> vector<64x128xf32>
    %174 = arith.addf %171, %173 : vector<64x128xf32>
    %c640 = arith.constant 640 : index
    %c0_83 = arith.constant 0 : index
    %175 = vector.load %arg5[%c640, %c0_83] : memref<2048x128xbf16, #tpu.memory_space<vmem>>, vector<128x128xbf16>
    %cst_84 = arith.constant dense<0.000000e+00> : vector<64x128xf32>
    %176 = tpu.matmul %63, %175, %cst_84 {dimension_numbers = #tpu.dot_dimension_numbers<[1], [0], [0], [1], [0, 0, 1, 1], [], []>} : vector<64x128xbf16>, vector<128x128xbf16>, vector<64x128xf32> -> vector<64x128xf32>
    %177 = arith.addf %174, %176 : vector<64x128xf32>
    %c768 = arith.constant 768 : index
    %c0_85 = arith.constant 0 : index
    %178 = vector.load %arg5[%c768, %c0_85] : memref<2048x128xbf16, #tpu.memory_space<vmem>>, vector<128x128xbf16>
    %cst_86 = arith.constant dense<0.000000e+00> : vector<64x128xf32>
    %179 = tpu.matmul %93, %178, %cst_86 {dimension_numbers = #tpu.dot_dimension_numbers<[1], [0], [0], [1], [0, 0, 1, 1], [], []>} : vector<64x128xbf16>, vector<128x128xbf16>, vector<64x128xf32> -> vector<64x128xf32>
    %180 = arith.addf %177, %179 : vector<64x128xf32>
    %c896 = arith.constant 896 : index
    %c0_87 = arith.constant 0 : index
    %181 = vector.load %arg5[%c896, %c0_87] : memref<2048x128xbf16, #tpu.memory_space<vmem>>, vector<128x128xbf16>
    %cst_88 = arith.constant dense<0.000000e+00> : vector<64x128xf32>
    %182 = tpu.matmul %108, %181, %cst_88 {dimension_numbers = #tpu.dot_dimension_numbers<[1], [0], [0], [1], [0, 0, 1, 1], [], []>} : vector<64x128xbf16>, vector<128x128xbf16>, vector<64x128xf32> -> vector<64x128xf32>
    %183 = arith.addf %180, %182 : vector<64x128xf32>
    %c0_89 = arith.constant 0 : index
    %c128_90 = arith.constant 128 : index
    %184 = vector.load %arg6[%c0_89, %c128_90] : memref<1x512xf32, #tpu.memory_space<vmem>>, vector<1x128xf32>
    %185 = vector.broadcast %184 : vector<1x128xf32> to vector<64x128xf32>
    %186 = arith.addf %183, %185 : vector<64x128xf32>
    %c0_91 = arith.constant 0 : index
    %c128_92 = arith.constant 128 : index
    %187 = vector.load %arg7[%c0_91, %c128_92] : memref<64x512xf32, #tpu.memory_space<vmem>>, vector<64x128xf32>
    tpu.vector_store %arg7[%c0_91, %c128_92], %186 {strides = array<i32>} : memref<64x512xf32, #tpu.memory_space<vmem>>, vector<64x128xf32>,
    %cst_93 = arith.constant 0.000000e+00 : f32
    %188 = vector.broadcast %cst_93 : f32 to vector<64x128xf32>
    %c1024 = arith.constant 1024 : index
    %c0_94 = arith.constant 0 : index
    %189 = vector.load %arg5[%c1024, %c0_94] : memref<2048x128xbf16, #tpu.memory_space<vmem>>, vector<128x128xbf16>
    %cst_95 = arith.constant dense<0.000000e+00> : vector<64x128xf32>
    %190 = tpu.matmul %78, %189, %cst_95 {dimension_numbers = #tpu.dot_dimension_numbers<[1], [0], [0], [1], [0, 0, 1, 1], [], []>} : vector<64x128xbf16>, vector<128x128xbf16>, vector<64x128xf32> -> vector<64x128xf32>
    %191 = arith.addf %188, %190 : vector<64x128xf32>
    %c1152 = arith.constant 1152 : index
    %c0_96 = arith.constant 0 : index
    %192 = vector.load %arg5[%c1152, %c0_96] : memref<2048x128xbf16, #tpu.memory_space<vmem>>, vector<128x128xbf16>
    %cst_97 = arith.constant dense<0.000000e+00> : vector<64x128xf32>
    %193 = tpu.matmul %93, %192, %cst_97 {dimension_numbers = #tpu.dot_dimension_numbers<[1], [0], [0], [1], [0, 0, 1, 1], [], []>} : vector<64x128xbf16>, vector<128x128xbf16>, vector<64x128xf32> -> vector<64x128xf32>
    %194 = arith.addf %191, %193 : vector<64x128xf32>
    %c1280 = arith.constant 1280 : index
    %c0_98 = arith.constant 0 : index
    %195 = vector.load %arg5[%c1280, %c0_98] : memref<2048x128xbf16, #tpu.memory_space<vmem>>, vector<128x128xbf16>
    %cst_99 = arith.constant dense<0.000000e+00> : vector<64x128xf32>
    %196 = tpu.matmul %123, %195, %cst_99 {dimension_numbers = #tpu.dot_dimension_numbers<[1], [0], [0], [1], [0, 0, 1, 1], [], []>} : vector<64x128xbf16>, vector<128x128xbf16>, vector<64x128xf32> -> vector<64x128xf32>
    %197 = arith.addf %194, %196 : vector<64x128xf32>
    %c1408 = arith.constant 1408 : index
    %c0_100 = arith.constant 0 : index
    %198 = vector.load %arg5[%c1408, %c0_100] : memref<2048x128xbf16, #tpu.memory_space<vmem>>, vector<128x128xbf16>
    %cst_101 = arith.constant dense<0.000000e+00> : vector<64x128xf32>
    %199 = tpu.matmul %138, %198, %cst_101 {dimension_numbers = #tpu.dot_dimension_numbers<[1], [0], [0], [1], [0, 0, 1, 1], [], []>} : vector<64x128xbf16>, vector<128x128xbf16>, vector<64x128xf32> -> vector<64x128xf32>
    %200 = arith.addf %197, %199 : vector<64x128xf32>
    %c0_102 = arith.constant 0 : index
    %c256_103 = arith.constant 256 : index
    %201 = vector.load %arg6[%c0_102, %c256_103] : memref<1x512xf32, #tpu.memory_space<vmem>>, vector<1x128xf32>
    %202 = vector.broadcast %201 : vector<1x128xf32> to vector<64x128xf32>
    %203 = arith.addf %200, %202 : vector<64x128xf32>
    %c0_104 = arith.constant 0 : index
    %c256_105 = arith.constant 256 : index
    %204 = vector.load %arg7[%c0_104, %c256_105] : memref<64x512xf32, #tpu.memory_space<vmem>>, vector<64x128xf32>
    tpu.vector_store %arg7[%c0_104, %c256_105], %203 {strides = array<i32>} : memref<64x512xf32, #tpu.memory_space<vmem>>, vector<64x128xf32>,
    %cst_106 = arith.constant 0.000000e+00 : f32
    %205 = vector.broadcast %cst_106 : f32 to vector<64x128xf32>
    %c1536 = arith.constant 1536 : index
    %c0_107 = arith.constant 0 : index
    %206 = vector.load %arg5[%c1536, %c0_107] : memref<2048x128xbf16, #tpu.memory_space<vmem>>, vector<128x128xbf16>
    %cst_108 = arith.constant dense<0.000000e+00> : vector<64x128xf32>
    %207 = tpu.matmul %93, %206, %cst_108 {dimension_numbers = #tpu.dot_dimension_numbers<[1], [0], [0], [1], [0, 0, 1, 1], [], []>} : vector<64x128xbf16>, vector<128x128xbf16>, vector<64x128xf32> -> vector<64x128xf32>
    %208 = arith.addf %205, %207 : vector<64x128xf32>
    %c1664 = arith.constant 1664 : index
    %c0_109 = arith.constant 0 : index
    %209 = vector.load %arg5[%c1664, %c0_109] : memref<2048x128xbf16, #tpu.memory_space<vmem>>, vector<128x128xbf16>
    %cst_110 = arith.constant dense<0.000000e+00> : vector<64x128xf32>
    %210 = tpu.matmul %108, %209, %cst_110 {dimension_numbers = #tpu.dot_dimension_numbers<[1], [0], [0], [1], [0, 0, 1, 1], [], []>} : vector<64x128xbf16>, vector<128x128xbf16>, vector<64x128xf32> -> vector<64x128xf32>
    %211 = arith.addf %208, %210 : vector<64x128xf32>
    %c1792 = arith.constant 1792 : index
    %c0_111 = arith.constant 0 : index
    %212 = vector.load %arg5[%c1792, %c0_111] : memref<2048x128xbf16, #tpu.memory_space<vmem>>, vector<128x128xbf16>
    %cst_112 = arith.constant dense<0.000000e+00> : vector<64x128xf32>
    %213 = tpu.matmul %138, %212, %cst_112 {dimension_numbers = #tpu.dot_dimension_numbers<[1], [0], [0], [1], [0, 0, 1, 1], [], []>} : vector<64x128xbf16>, vector<128x128xbf16>, vector<64x128xf32> -> vector<64x128xf32>
    %214 = arith.addf %211, %213 : vector<64x128xf32>
    %c1920 = arith.constant 1920 : index
    %c0_113 = arith.constant 0 : index
    %215 = vector.load %arg5[%c1920, %c0_113] : memref<2048x128xbf16, #tpu.memory_space<vmem>>, vector<128x128xbf16>
    %cst_114 = arith.constant dense<0.000000e+00> : vector<64x128xf32>
    %216 = tpu.matmul %153, %215, %cst_114 {dimension_numbers = #tpu.dot_dimension_numbers<[1], [0], [0], [1], [0, 0, 1, 1], [], []>} : vector<64x128xbf16>, vector<128x128xbf16>, vector<64x128xf32> -> vector<64x128xf32>
    %217 = arith.addf %214, %216 : vector<64x128xf32>
    %c0_115 = arith.constant 0 : index
    %c384_116 = arith.constant 384 : index
    %218 = vector.load %arg6[%c0_115, %c384_116] : memref<1x512xf32, #tpu.memory_space<vmem>>, vector<1x128xf32>
    %219 = vector.broadcast %218 : vector<1x128xf32> to vector<64x128xf32>
    %220 = arith.addf %217, %219 : vector<64x128xf32>
    %c0_117 = arith.constant 0 : index
    %c384_118 = arith.constant 384 : index
    %221 = vector.load %arg7[%c0_117, %c384_118] : memref<64x512xf32, #tpu.memory_space<vmem>>, vector<64x128xf32>
    tpu.vector_store %arg7[%c0_117, %c384_118], %220 {strides = array<i32>} : memref<64x512xf32, #tpu.memory_space<vmem>>, vector<64x128xf32>,
    return
  }
  func.func @transform_0(%arg0: i32) -> (i32, i32) {
    %c0_i32 = arith.constant 0 : i32
    %c0_i32_0 = arith.constant 0 : i32
    %c0_i32_1 = arith.constant 0 : i32
    return %c0_i32, %c0_i32_0 : i32, i32
  }
  func.func @transform_1(%arg0: i32) -> (i32, i32) {
    %c0_i32 = arith.constant 0 : i32
    %c0_i32_0 = arith.constant 0 : i32
    return %arg0, %c0_i32 : i32, i32
  }
  func.func @transform_2(%arg0: i32) -> (i32, i32) {
    %c0_i32 = arith.constant 0 : i32
    %c0_i32_0 = arith.constant 0 : i32
    %c0_i32_1 = arith.constant 0 : i32
    return %c0_i32, %c0_i32_0 : i32, i32
  }
  func.func @transform_3(%arg0: i32) -> (i32, i32) {
    %c0_i32 = arith.constant 0 : i32
    %c0_i32_0 = arith.constant 0 : i32
    %c0_i32_1 = arith.constant 0 : i32
    return %c0_i32, %c0_i32_0 : i32, i32
  }
  func.func @transform_4(%arg0: i32) -> (i32, i32) {
    %c0_i32 = arith.constant 0 : i32
    %c0_i32_0 = arith.constant 0 : i32
    %c0_i32_1 = arith.constant 0 : i32
    return %c0_i32, %c0_i32_0 : i32, i32
  }
  func.func @transform_5(%arg0: i32) -> (i32, i32) {
    %c0_i32 = arith.constant 0 : i32
    %c0_i32_0 = arith.constant 0 : i32
    %c0_i32_1 = arith.constant 0 : i32
    return %c0_i32, %c0_i32_0 : i32, i32
  }
  func.func @transform_6(%arg0: i32) -> (i32, i32) {
    %c0_i32 = arith.constant 0 : i32
    %c0_i32_0 = arith.constant 0 : i32
    return %arg0, %c0_i32 : i32, i32
  }
}

</mosaic_0001>

<bundles_post_ra>
// kernel: unet_skip_block_forward.1
= control target key start
LH: loop header
LB: loop body
LE: loop exit
PB: predicated region body
PF: predicated region fallthrough
CT: control target
= control target key end

     0   :  { %s4364_s21 = smov 0   ;;  %s5464_s0 = inlined_call_operand.vmem [shape: s32[64,1], index: 0, kind: input, shape index: {}]   ;;  %s5465_s1 = inlined_call_operand.vmem [shape: bf16[128,64], index: 1, kind: input, shape index: {}]   ;;  %s5466_s2 = inlined_call_operand.vmem [shape: bf16[64,128], index: 2, kind: input, shape index: {}]   ;;  %s5467_s3 = inlined_call_operand.vmem [shape: f32[1,128], index: 3, kind: input, shape index: {}]   ;;  %s5468_s4 = inlined_call_operand.vmem [shape: bf16[2048,128], index: 4, kind: input, shape index: {}]   ;;  %s5469_s5 = inlined_call_operand.vmem [shape: f32[1,512], index: 5, kind: input, shape index: {}]   ;;  %s5470_s6 = inlined_call_operand.vmem [shape: f32[128,512], index: 6, kind: output, shape index: {}]  }
   0x1 LB: > { %s3124_s22 = sadd.s32 4294967295, %s4325_s21   ;;  %p3128_p0 = scmp.ge.s32.totalorder %s4325_s21, 1  ;;  %s4325_s21 = sphi %s4364_s21, %s16_s21  }
   0x2   : > { %p213_p1 = scmp.lt.s32.totalorder %s4325_s21, 3 }
   0x4   : > { %p214_p2 = pnand %p3128_p0, %p213_p1 }
   0x5   : > { %v4182_v0 = vld [vmem:[%s5466_s2] sm:$0xff] (!%p214_p2)   ;;  %s3129_s25 = sshll.u32 (!%p214_p2), %s3124_s22, 3  ;;  %v4183_v1 = vld [vmem:[%s5466_s2 + $0x8] sm:$0xff] (!%p214_p2)   ;;  %v4184_v2 = vld [vmem:[%s5466_s2 + $0x10] sm:$0xff] (!%p214_p2)   ;;  %vm5474_vm0 = vcmask (!%p214_p2), 523264   ;;  %v4327_v6 = vmov (!%p214_p2), 0  }
   0x6   : > { %217 = sbr.rel (%p214_p2) target bundleno = 704 (0x2c0), region = 44  ;;  %p245_p3 = scmp.lt.s32.totalorder (!%p214_p2), %s3129_s25, 15  ;;  %3674 = vmatprep.subr.bf16.mxu0 (!%p214_p2), %v4182_v0  ;;  %v4386_v3 = vld [vmem:[%s5464_s0 + $0x10] sm:$0xff] (!%p214_p2)  ;;  %v4391_v4 = vld [vmem:[%s5464_s0] sm:$0xff] (!%p214_p2)  ;;  %v4396_v5 = vld [vmem:[%s5464_s0 + $0x18] sm:$0xff] (!%p214_p2)  ;;  %4181 = vset.pattern.permute.xlu1 (!%p214_p2), %v4327_v6  ;;  %v5488_v40 = vmov (!%p214_p2), 0 }
   0x7   : > { %3675 = vmatpush3.bf16.msra.mxu0 (!%p214_p2), %v4182_v0  ;;  %4180 = vset.pattern.permute.xlu0 (!%p214_p2), %v4327_v6  ;;  %vm268_vm1 = vcmp.ge.s32.totalorder (!%p214_p2), %v4386_v3, 0  ;;  %vm266_vm2 = vcmp.ge.s32.totalorder (!%p214_p2), %v4391_v4, 0  ;;  %v4185_v7 = vld [vmem:[%s5466_s2 + $0x18] sm:$0xff] (!%p214_p2)   ;;  %vm587_vm3 = vcmp.lt.s32.totalorder (!%p214_p2), %v4391_v4, 8  ;;  %vm269_vm4 = vcmp.ge.s32.totalorder (!%p214_p2), %v4396_v5, 0  ;;  %v4422_v10 = vld [vmem:[%s5464_s0 + $0x8] sm:$0xff] (!%p214_p2) }
   0x8   : > { %3676 = vmatprep.subr.bf16.mxu0 (!%p214_p2), %v4183_v1  ;;  %v429_v8 = vsel (!%p214_p2), %vm268_vm1, 1, %v4327_v6  ;;  %v427_v9 = vsel (!%p214_p2), %vm266_vm2, 1, %v4327_v6  ;;  %v663_v12 = vadd.s32 (!%p214_p2), 1, %v4391_v4  ;;  %v430_v13 = vsel (!%p214_p2), %vm269_vm4, 1, %v4327_v6  ;;  %vm595_vm7 = vmand (!%p214_p2), %vm266_vm2, %vm587_vm3  ;;  %v4458_v24 = vld [vmem:[%s5464_s0 + $0x28] sm:$0xff] (!%p214_p2)  ;;  %v4470_v27 = vld [vmem:[%s5464_s0 + $0x20] sm:$0xff] (!%p214_p2) }
   0x9   : > { %442 = vperm.xlu1 (!%p214_p2), %4181, %v429_v8   ;;  %436 = vperm.xlu0 (!%p214_p2), %4180, %v427_v9   ;;  %vm267_vm5 = vcmp.ge.s32.totalorder (!%p214_p2), %v4422_v10, 0  ;;  %vm588_vm6 = vcmp.lt.s32.totalorder (!%p214_p2), %v4422_v10, 8  ;;  %v664_v15 = vadd.s32 (!%p214_p2), 1, %v4422_v10  ;;  %vm589_vm10 = vcmp.lt.s32.totalorder (!%p214_p2), %v4386_v3, 8  ;;  %v4481_v29 = vld [vmem:[%s5464_s0 + $0x38] sm:$0xff] (!%p214_p2)  ;;  %v4496_v33 = vld [vmem:[%s5464_s0 + $0x30] sm:$0xff] (!%p214_p2) }
   0xa   : > { %v428_v14 = vsel (!%p214_p2), %vm267_vm5, 1, %v4327_v6  ;;  %vm671_vm8 = vcmp.ge.s32.totalorder (!%p214_p2), %v663_v12, 0  ;;  %vm679_vm9 = vcmp.lt.s32.totalorder (!%p214_p2), %v663_v12, 8  ;;  %vm596_vm11 = vmand (!%p214_p2), %vm267_vm5, %vm588_vm6  ;;  %v666_v16 = vadd.s32 (!%p214_p2), 1, %v4396_v5  ;;  %v4196_v22 = vld [vmem:[%s5468_s4 + $0x58] sm:$0xff] (!%p214_p2)   ;;  %v4199_v26 = vld [vmem:[%s5468_s4 + $0x160] sm:$0xff] (!%p214_p2)  }
   0xb   : > { %3677 = vmatpush3.bf16.msra.mxu0 (!%p214_p2), %v4183_v1  ;;  %v665_v17 = vadd.s32 (!%p214_p2), 1, %v4386_v3  ;;  %v604_v18 = vsel (!%p214_p2), %vm596_vm11, 1, %v4327_v6  ;;  %v603_v19 = vsel (!%p214_p2), %vm595_vm7, 1, %v4327_v6  ;;  %vm672_vm12 = vcmp.ge.s32.totalorder (!%p214_p2), %v664_v15, 0  ;;  %vm687_vm14 = vmand (!%p214_p2), %vm671_vm8, %vm679_vm9  ;;  %v4201_v28 = vld [vmem:[%s5468_s4 + $0x168] sm:$0xff] (!%p214_p2)   ;;  %v4205_v32 = vld [vmem:[%s5468_s4 + $0x178] sm:$0xff] (!%p214_p2)  }
   0xc   : > { %3678 = vmatprep.subr.bf16.mxu0 (!%p214_p2), %v4184_v2  ;;  %vm680_vm13 = vcmp.lt.s32.totalorder (!%p214_p2), %v664_v15, 8  ;;  %vm590_vm2 = vcmp.lt.s32.totalorder (!%p214_p2), %v4396_v5, 8  ;;  %vm674_vm3 = vcmp.ge.s32.totalorder (!%p214_p2), %v666_v16, 0  ;;  %vm682_vm5 = vcmp.lt.s32.totalorder (!%p214_p2), %v666_v16, 8  ;;  %vm4450_vm6 = vmand (!%p214_p2), %vm268_vm1, %vm589_vm10 }
   0xd   : > { %s5539_s25 = smov (!%p245_p3, %s3129_s25), 15  ;;  %445 = vperm.xlu1 %4181, %v430_v13   ;;  %439 = vperm.xlu0 %4180, %v428_v14   ;;  %vm688_vm15 = vmand %vm672_vm12, %vm680_vm13  ;;  %vm673_vm7 = vcmp.ge.s32.totalorder %v665_v17, 0  ;;  %vm681_vm8 = vcmp.lt.s32.totalorder %v665_v17, 8  ;;  %v695_v25 = vsel %vm687_vm14, 1, %v4327_v6  ;;  %vm592_vm1 = vcmp.lt.s32.totalorder %v4458_v24, 8  ;;  %v4190_v13 = vld [vmem:[%s5468_s4 + $0x40] sm:$0xff]  }
   0xe   : > { %s3130_s12 = sshll.u32 %s5539_s25, 2  ;;  %v696_v23 = vsel %vm688_vm15, 1, %v4327_v6  ;;  %vm4463_vm9 = vmand %vm269_vm4, %vm590_vm2  ;;  %vm591_vm4 = vcmp.lt.s32.totalorder %v4470_v27, 8  ;;  %v668_v30 = vadd.s32 1, %v4458_v24  ;;  %v667_v31 = vadd.s32 1, %v4470_v27  ;;  %v4191_v14 = vld [vmem:[%s5468_s4 + $0x140] sm:$0xff]   ;;  %3690 = vmatprep.subr.bf16.mxu1 %v4190_v13 }
   0xf   : > { %s4409_s17 = scalar_lea.vmem %s5465_s1, %s3130_s12  ;;  %3679 = vmatpush3.bf16.msra.mxu0 %v4184_v2  ;;  %vm4474_vm10 = vmand %vm674_vm3, %vm682_vm5  ;;  %vm5472_vm12 = vcmp.ge.s32.totalorder %v4458_v24, 0  ;;  %vm594_vm13 = vcmp.lt.s32.totalorder %v4481_v29, 8  ;;  %v670_v34 = vadd.s32 1, %v4481_v29  ;;  %v606_v36 = vsel %vm4463_vm9, 1, %v4327_v6  ;;  %3691 = vmatpush3.bf16.msra.mxu1 %v4190_v13  ;;  %v4192_v17 = vld [vmem:[%s5468_s4 + $0x48] sm:$0xff]   ;;  %s3473_s23 = sshll.u32 %s5539_s25, 5 }
  0x10   : > { %v4186_v11 = vld [vmem:[%s4409_s17] sm:$0xff]   ;;  %3680 = vmatprep.subr.bf16.mxu0 %v4185_v7  ;;  %v4187_v20 = vld [vmem:[%s4409_s17 + $0x8] sm:$0xff]   ;;  %v4188_v21 = vld [vmem:[%s4409_s17 + $0x10] sm:$0xff]   ;;  %vm5471_vm14 = vcmp.ge.s32.totalorder %v4470_v27, 0  ;;  %vm676_vm2 = vcmp.ge.s32.totalorder %v668_v30, 0  ;;  %vm684_vm3 = vcmp.lt.s32.totalorder %v668_v30, 8  ;;  %3692 = vmatprep.subr.bf16.mxu1 %v4192_v17  ;;  %s5418_s29 = scalar_lea.vmem %s5470_s6, %s3473_s23 }
  0x11   : > { %3682 = vmatprep.mubr.msk.bf16.mxu0 %vm5474_vm0, %v4186_v11  ;;  %615 = vperm.xlu1 %4181, %v604_v18   ;;  %vm4488_vm11 = vmand %vm673_vm7, %vm681_vm8  ;;  %v4189_v35 = vld [vmem:[%s4409_s17 + $0x18] sm:$0xff]   ;;  %v605_v38 = vsel %vm4450_vm6, 1, %v4327_v6  ;;  %vm5473_vm5 = vcmp.ge.s32.totalorder %v4481_v29, 0  ;;  %vm675_vm8 = vcmp.ge.s32.totalorder %v667_v31, 0  ;;  %vm683_vm9 = vcmp.lt.s32.totalorder %v667_v31, 8  ;;  %v4193_v18 = vld [vmem:[%s5468_s4 + $0x148] sm:$0xff]  }
  0x12   : > { %612 = vperm.xlu0 %4180, %v603_v19   ;;  %vm4509_vm15 = vmand %vm5472_vm12, %vm592_vm1  ;;  %v669_v41 = vadd.s32 1, %v4496_v33  ;;  %v496_v42 = vadd.s32 4294967295, %v4422_v10  ;;  %v495_v43 = vadd.s32 4294967295, %v4391_v4  ;;  %v5490_v44 = vmov 0  ;;  %v4679_v30 = vld [vmem:[%s5468_s4] sm:$0xff]   ;;  %v4203_v31 = vld [vmem:[%s5468_s4 + $0x170] sm:$0xff]  }
  0x13   : > { %3681 = vmatpush3.bf16.msra.mxu0 %v4185_v7  ;;  %vm4521_vm7 = vmand %vm5471_vm14, %vm591_vm4  ;;  %vm5475_vm4 = vcmp.ge.s32.totalorder %v4496_v33, 0  ;;  %vm678_vm12 = vcmp.ge.s32.totalorder %v670_v34, 0  ;;  %v698_v45 = vsel %vm4474_vm10, 1, %v4327_v6  ;;  %v5492_v46 = vmov 0  ;;  %3693 = vmatpush3.bf16.msra.mxu1 %v4192_v17  ;;  %v4312_v10 = vld [vmem:[%s5468_s4 + $0x2e8] sm:$0xff]  }
  0x14   : > { %vm4527_vm1 = vmand %vm5473_vm5, %vm594_vm13  ;;  %vm686_vm13 = vcmp.lt.s32.totalorder %v670_v34, 8  ;;  %vm685_vm6 = vcmp.lt.s32.totalorder %v669_v41, 8  ;;  %v498_v47 = vadd.s32 4294967295, %v4396_v5  ;;  %v697_v48 = vsel %vm4488_vm11, 1, %v4327_v6  ;;  %3786 = vmatprep.subr.bf16.mxu0 %v4191_v14 }
  0x15   : > { %707 = vperm.xlu1 %4181, %v696_v23   ;;  %v5489_v40 = vsel %vm4527_vm1, 4294967295, %v5488_v40  ;;  %vm4536_vm14 = vmand %vm676_vm2, %vm684_vm3  ;;  %vm5494_vm2 = vcmp.lt.s32.totalorder %v4496_v33, 8  ;;  %vm504_vm10 = vcmp.ge.s32.totalorder %v496_v42, 0  ;;  %v5498_v50 = vmov 0  ;;  %v4198_v23 = vld [vmem:[%s5468_s4 + $0x60] sm:$0xff]  }
  0x16   : > { %3683 = vmatmul.mubr.msk.bf16.vlgmr.msra.gmra.mrb[0].mxu0 %vm5474_vm0, %v4187_v20  ;;  %704 = vperm.xlu0 %4180, %v695_v25   ;;  %v5491_v44 = vsel %vm4536_vm14, 4294967295, %v5490_v44  ;;  %vm4543_vm5 = vmand %vm675_vm8, %vm683_vm9  ;;  %vm512_vm8 = vcmp.lt.s32.totalorder %v496_v42, 8  ;;  %vm5497_vm9 = vcmask 523264   ;;  %vm511_vm14 = vcmp.lt.s32.totalorder %v495_v43, 8  ;;  %v4194_v20 = vld [vmem:[%s5468_s4 + $0x50] sm:$0xff]  }
  0x17   : > { %3686 = vmatprep.mubr.msk.bf16.mxu0 %vm5474_vm0, %v4188_v21  ;;  %v5493_v46 = vsel %vm4543_vm5, 4294967295, %v5492_v46  ;;  %vm677_vm0 = vcmp.ge.s32.totalorder %v669_v41, 0  ;;  %vm4555_vm3 = vmand %vm5475_vm4, %vm5494_vm2  ;;  %vm503_vm5 = vcmp.ge.s32.totalorder %v495_v43, 0  ;;  %vm5500_vm11 = vcmp.ge.s32.totalorder %v4458_v24, 0  ;;  %3787 = vmatpush3.bf16.msra.mxu0 %v4191_v14  ;;  %v4195_v21 = vld [vmem:[%s5468_s4 + $0x150] sm:$0xff]  }
  0x18   : > { %vm4560_vm1 = vmand %vm678_vm12, %vm686_vm13  ;;  %v432_v51 = vsel %vm5500_vm11, 1, %v4327_v6  ;;  %vm5501_vm2 = vcmp.ge.s32.totalorder %v4470_v27, 0  ;;  %vm5504_vm12 = vcmp.ge.s32.totalorder %v4481_v29, 0  ;;  %vm5505_vm13 = vcmp.ge.s32.totalorder %v4496_v33, 0  ;;  %3788 = vmatprep.subr.bf16.mxu0 %v4193_v18  ;;  %3694 = vmatprep.subr.bf16.mxu1 %v4194_v20  ;;  %v4202_v25 = vld [vmem:[%s5468_s4 + $0x70] sm:$0xff]  }
  0x19   : > { %621 = vperm.xlu1 %4181, %v606_v36   ;;  %v5499_v50 = vsel %vm4560_vm1, 4294967295, %v5498_v50  ;;  %v431_v52 = vsel %vm5501_vm2, 1, %v4327_v6  ;;  %vm4570_vm4 = vmand %vm677_vm0, %vm685_vm6  ;;  %v434_v54 = vsel %vm5504_vm12, 1, %v4327_v6  ;;  %v433_v55 = vsel %vm5505_vm13, 1, %v4327_v6  ;;  %3695 = vmatpush3.bf16.msra.mxu1 %v4194_v20 }
  0x1a   : > { %618 = vperm.xlu0 %4180, %v605_v38   ;;  %vm506_vm11 = vcmp.ge.s32.totalorder %v498_v47, 0  ;;  %vm514_vm1 = vcmp.lt.s32.totalorder %v498_v47, 8  ;;  %v608_v57 = vsel %vm4509_vm15, 1, %v4327_v6  ;;  %v607_v58 = vsel %vm4521_vm7, 1, %v4327_v6  ;;  %vm519_vm0 = vmand %vm503_vm5, %vm511_vm14  ;;  %3696 = vmatprep.subr.bf16.mxu1 %v4196_v22 }
  0x1b   : > { %vm5508_vm6 = vnez %v5491_v44  ;;  %v497_v62 = vadd.s32 4294967295, %v4386_v3  ;;  %v609_v63 = vsel %vm4555_vm3, 1, %v4327_v6  ;;  %vm5511_vm14 = vnez %v5499_v50  ;;  %vm522_vm15 = vmand %vm506_vm11, %vm514_vm1  ;;  %3789 = vmatpush3.bf16.msra.mxu0 %v4193_v18  ;;  %v4208_v18 = vld [vmem:[%s5468_s4 + $0x8] sm:$0xff]  }
  0x1c   : > { %v700_v59 = vsel %vm5508_vm6, 1, %v4327_v6  ;;  %v702_v0 = vsel %vm5511_vm14, 1, %v4327_v6  ;;  %v701_v1 = vsel %vm4570_vm4, 1, %v4327_v6  ;;  %v500_v2 = vadd.s32 4294967295, %v4458_v24  ;;  %3790 = vmatprep.subr.bf16.mxu0 %v4195_v21  ;;  %v4200_v24 = vld [vmem:[%s5468_s4 + $0x68] sm:$0xff]  }
  0x1d   : > { %713 = vperm.xlu1 %4181, %v698_v45   ;;  %v527_v4 = vsel %vm519_vm0, 1, %v4327_v6  ;;  %v499_v5 = vadd.s32 4294967295, %v4470_v27  ;;  %v502_v7 = vadd.s32 4294967295, %v4481_v29  ;;  %v530_v8 = vsel %vm522_vm15, 1, %v4327_v6  ;;  %3697 = vmatpush3.bf16.msra.mxu1 %v4196_v22  ;;  %v4204_v27 = vld [vmem:[%s5468_s4 + $0x78] sm:$0xff]  }
  0x1e   : > { %3687 = vmatmul.mubr.msk.bf16.gmra.mrb[4].mxu0 %vm5497_vm9, %v4189_v35  ;;  %710 = vperm.xlu0 %4180, %v697_v48   ;;  %vm4580_vm9 = vmand %vm504_vm10, %vm512_vm8  ;;  %vm5509_vm10 = vnez %v5493_v46  ;;  %vm5510_vm8 = vnez %v5489_v40  ;;  %v501_v9 = vadd.s32 4294967295, %v4496_v33  ;;  %vm505_vm5 = vcmp.ge.s32.totalorder %v497_v62, 0  ;;  %v4691_v33 = vld [vmem:[%s5468_s4 + $0x100] sm:$0xff]  }
  0x1f   : > { %v699_v60 = vsel %vm5509_vm10, 1, %v4327_v6  ;;  %v610_v61 = vsel %vm5510_vm8, 1, %v4327_v6  ;;  %v528_v3 = vsel %vm4580_vm9, 1, %v4327_v6  ;;  %vm513_vm7 = vcmp.lt.s32.totalorder %v497_v62, 8  ;;  %3791 = vmatpush3.bf16.msra.mxu0 %v4195_v21  ;;  %3698 = vmatprep.subr.bf16.mxu1 %v4198_v23 }
  0x20   : > { %vm508_vm1 = vcmp.ge.s32.totalorder %v500_v2, 0  ;;  %vm516_vm4 = vcmp.lt.s32.totalorder %v500_v2, 8  ;;  %vm507_vm3 = vcmp.ge.s32.totalorder %v499_v5, 0  ;;  %vm515_vm2 = vcmp.lt.s32.totalorder %v499_v5, 8  ;;  %vm521_vm0 = vmand %vm505_vm5, %vm513_vm7 }
  0x21   : > { %451 = vperm.xlu1 %4181, %v432_v51   ;;  %vm510_vm12 = vcmp.ge.s32.totalorder %v502_v7, 0  ;;  %vm518_vm13 = vcmp.lt.s32.totalorder %v502_v7, 8  ;;  %vm509_vm9 = vcmp.ge.s32.totalorder %v501_v9, 0  ;;  %vm517_vm11 = vcmp.lt.s32.totalorder %v501_v9, 8  ;;  %vm524_vm6 = vmand %vm508_vm1, %vm516_vm4  ;;  %3699 = vmatpush3.bf16.msra.mxu1 %v4198_v23 }
  0x22   : > { %448 = vperm.xlu0 %4180, %v431_v52   ;;  %vm523_vm10 = vmand %vm507_vm3, %vm515_vm2  ;;  %v529_v11 = vsel %vm521_vm0, 1, %v4327_v6  ;;  %v532_v12 = vsel %vm524_vm6, 1, %v4327_v6  ;;  %3700 = vmatprep.subr.bf16.mxu1 %v4200_v24  ;;  %v4328_v29 = vmov 0.0  }
  0x23   : > { %vm526_vm8 = vmand %vm510_vm12, %vm518_vm13  ;;  %v531_v15 = vsel %vm523_vm10, 1, %v4327_v6  ;;  %476 = vst [vmem:[#allocation2 + $0x8] sm:$0xff] %v4328_v29 }
  0x24   : > { %vm4619_vm14 = vmand %vm509_vm9, %vm517_vm11  ;;  %v534_v16 = vsel %vm526_vm8, 1, %v4327_v6  ;;  %475 = vst [vmem:[#allocation2] sm:$0xff] %v4328_v29 }
  0x25   : > { %457 = vperm.xlu1 %4181, %v434_v54   ;;  %v533_v19 = vsel %vm4619_vm14, 1, %v4327_v6  ;;  %v4197_v6 = vld [vmem:[%s5468_s4 + $0x158] sm:$0xff]   ;;  %3701 = vmatpush3.bf16.msra.mxu1 %v4200_v24  ;;  %477 = vst [vmem:[#allocation2 + $0x50] sm:$0xff] %v4328_v29  ;;  %478 = vst [vmem:[#allocation2 + $0x58] sm:$0xff] %v4328_v29  ;;  %v3134_v54 = vld [vmem:[%s5467_s3] ss:$0 sm:$0xff] }
  0x26   : > { %454 = vperm.xlu0 %4180, %v433_v55   ;;  %3792 = vmatprep.subr.bf16.mxu0 %v4197_v6 }
  0x27   : > { %3793 = vmatpush3.bf16.msra.mxu0 %v4197_v6  ;;  %3702 = vmatprep.subr.bf16.mxu1 %v4202_v25 }
  0x28   : > { %3794 = vmatprep.subr.bf16.mxu0 %v4199_v26 }
  0x29   : > { %627 = vperm.xlu1 %4181, %v608_v57   ;;  %3703 = vmatpush3.bf16.msra.mxu1 %v4202_v25 }
  0x2a   : > { %624 = vperm.xlu0 %4180, %v607_v58   ;;  %3704 = vmatprep.subr.bf16.mxu1 %v4204_v27 }
  0x2b   : > { %3795 = vmatpush3.bf16.msra.mxu0 %v4199_v26 }
  0x2c   : > { %3796 = vmatprep.subr.bf16.mxu0 %v4201_v28  ;;  %v833_v20 = vld [vmem:[#allocation2 + $0x51] sm:$0xff] }
  0x2d   : > { %719 = vperm.xlu1 %4181, %v700_v59   ;;  %3705 = vmatpush3.bf16.msra.mxu1 %v4204_v27 }
  0x2e   : > { %716 = vperm.xlu0 %4180, %v699_v60   ;;  %3714 = vmatprep.subr.bf16.mxu1 %v4679_v30 }
  0x2f   : > { %3797 = vmatpush3.bf16.msra.mxu0 %v4201_v28 }
  0x30   : > { %3798 = vmatprep.subr.bf16.mxu0 %v4203_v31 }
  0x31   : > { %633 = vperm.xlu1 %4181, %v610_v61  }
  0x32   : > { %630 = vperm.xlu0 %4180, %v609_v63  }
  0x33   : > { %3799 = vmatpush3.bf16.msra.mxu0 %v4203_v31  ;;  %v4210_v31 = vld [vmem:[%s5468_s4 + $0x10] sm:$0xff]  }
  0x34   : > { %3800 = vmatprep.subr.bf16.mxu0 %v4205_v32 }
  0x35   : > { %725 = vperm.xlu1 %4181, %v702_v0  }
  0x36   : > { %722 = vperm.xlu0 %4180, %v701_v1  }
  0x37   : > { %3801 = vmatpush3.bf16.msra.mxu0 %v4205_v32 }
  0x38   : > { %3810 = vmatprep.subr.bf16.mxu0 %v4691_v33 }
  0x39   : > { %539 = vperm.xlu1 %4181, %v528_v3  }
  0x3a   : > { %536 = vperm.xlu0 %4180, %v527_v4  }
  0x3d   : > { %545 = vperm.xlu1 %4181, %v530_v8  }
  0x3e   : > { %542 = vperm.xlu0 %4180, %v529_v11  }
  0x41   : > { %551 = vperm.xlu1 %4181, %v532_v12  }
  0x42   : > { %548 = vperm.xlu0 %4180, %v531_v15  }
  0x45   : > { %557 = vperm.xlu1 %4181, %v534_v16  }
  0x46   : > { %554 = vperm.xlu0 %4180, %v533_v19  }
  0x88   : > { %v443_v34 = vpop.permute.xlu1 %442  ;;  %v437_v35 = vpop.permute.xlu0 %436 }
  0x89   : > { %vm461_vm15 = vcmp.eq.s32.totalorder %v443_v34, 1  ;;  %vm459_vm5 = vcmp.eq.s32.totalorder %v437_v35, 1  ;;  %v487_v35 = vld [vmem:[#allocation2 + $0x7] sm:$0xff] }
  0x8c   : > { %v446_v36 = vpop.permute.xlu1 %445  ;;  %v440_v37 = vpop.permute.xlu0 %439 }
  0x8d   : > { %vm462_vm4 = vcmp.eq.s32.totalorder %v446_v36, 1  ;;  %vm460_vm3 = vcmp.eq.s32.totalorder %v440_v37, 1 }
  0x90   : > { %v616_v38 = vpop.permute.xlu1 %615 }
  0x91   : > { %v613_v39 = vpop.permute.xlu0 %612  ;;  %vm636_vm7 = vcmp.eq.s32.totalorder %v616_v38, 1 }
  0x92   : > { %vm635_vm1 = vcmp.eq.s32.totalorder %v613_v39, 1 }
  0x93   : > { %vm4728_vm13 = vmpackc.low %vm636_vm7, %vm635_vm1 }
  0x94   : > { %v4694_v40 = vpop.permute.xlu1 %707 }
  0x95   : > { %v4696_v41 = vpop.permute.xlu0 %704  ;;  %vm728_vm9 = vcmp.eq.s32.totalorder %v4694_v40, 1 }
  0x96   : > { %vm727_vm0 = vcmp.eq.s32.totalorder %v4696_v41, 1  ;;  %v4209_v41 = vld [vmem:[%s5468_s4 + $0x108] sm:$0xff]  }
  0x98   : > { %v622_v42 = vpop.permute.xlu1 %621 }
  0x99   : > { %v619_v43 = vpop.permute.xlu0 %618  ;;  %vm638_vm2 = vcmp.eq.s32.totalorder %v622_v42, 1 }
  0x9a   : > { %vm637_vm12 = vcmp.eq.s32.totalorder %v619_v43, 1 }
  0x9b   : > { %vm4749_vm11 = vmpackc.low %vm638_vm2, %vm637_vm12 }
  0x9c   : > { %v4698_v44 = vpop.permute.xlu1 %713 }
  0x9d   : > { %v4700_v45 = vpop.permute.xlu0 %710  ;;  %vm730_vm14 = vcmp.eq.s32.totalorder %v4698_v44, 1  ;;  %v4214_v44 = vld [vmem:[%s5468_s4 + $0x20] sm:$0xff]  }
  0x9e   : > { %vm729_vm2 = vcmp.eq.s32.totalorder %v4700_v45, 1 }
  0xa0   : > { %v4702_v46 = vpop.permute.xlu1 %451 }
  0xa1   : > { %v4704_v47 = vpop.permute.xlu0 %448 }
  0xa4   : > { %v4706_v48 = vpop.permute.xlu1 %457 }
  0xa5   : > { %v4708_v49 = vpop.permute.xlu0 %454  ;;  %vm466_vm7 = vcmp.eq.s32.totalorder %v4706_v48, 1 }
  0xa6   : > { %vm465_vm6 = vcmp.eq.s32.totalorder %v4708_v49, 1 }
  0xa8   : > { %v4710_v50 = vpop.permute.xlu1 %627 }
  0xa9   : > { %v4712_v51 = vpop.permute.xlu0 %624  ;;  %vm640_vm10 = vcmp.eq.s32.totalorder %v4710_v50, 1 }
  0xaa   : > { %vm639_vm8 = vcmp.eq.s32.totalorder %v4712_v51, 1 }
  0xab   : > { %vm4774_vm1 = vmpackc.low %vm640_vm10, %vm639_vm8 }
  0xac   : > { %v4714_v52 = vpop.permute.xlu1 %719 }
  0xad   : > { %v4716_v53 = vpop.permute.xlu0 %716 }
  0xb0   : > { %v4721_v60 = vpop.permute.xlu1 %633 }
  0xb1   : > { %v4723_v0 = vpop.permute.xlu0 %630 }
  0xb4   : > { %v4734_v14 = vpop.permute.xlu1 %725 }
  0xb5   : > { %v4753_v21 = vpop.permute.xlu0 %722 }
  0xb8   : > { %v540_v36 = vpop.permute.xlu1 %539 }
  0xb9   : > { %vm560_vm12 = vcmp.eq.s32.totalorder %v540_v36, 1  ;;  %v537_v43 = vpop.permute.xlu0 %536 }
  0xba   : > { %vm559_vm10 = vcmp.eq.s32.totalorder %v537_v43, 1  ;;  %v4223_v43 = vld [vmem:[%s5468_s4 + $0x180] sm:$0xff]  }
  0xbb   : > { %vm4842_vm8 = vmpackc.low %vm560_vm12, %vm559_vm10 }
  0xe9   : > { %v3684_v55 = vpop.f32.mrb[0].mxu0 }
  0xea   : > { %v397_v56 = vadd.f32 %v3684_v55, %v3134_v54  ;;  %v388_v57 = vpop.f32.mrb[1].mxu0 }
  0xeb   : > { %v389_v58 = vadd.f32 %v3134_v54, %v388_v57  ;;  %v3685_v59 = vpop.f32.mrb[2].mxu0 }
  0xec   : > { %v421_v61 = vmax.f32 %v397_v56, 0.0  ;;  %v400_v62 = vadd.f32 %v3685_v59, %v3134_v54  ;;  %v391_v63 = vpop.f32.mrb[3].mxu0 }
  0xed   : > { %v419_v1 = vmax.f32 %v389_v58, 0.0  ;;  %v392_v2 = vadd.f32 %v3134_v54, %v391_v63  ;;  %v4212_v58 = vld [vmem:[%s5468_s4 + $0x18] sm:$0xff]   ;;  %v4211_v63 = vld [vmem:[%s5468_s4 + $0x110] sm:$0xff]  }
  0xee   : > { %v469_v3 = vsel %vm461_vm15, %v421_v61, 0.0  ;;  %v422_v4 = vmax.f32 %v400_v62, 0.0  ;;  %vm463_vm15 = vcmp.eq.s32.totalorder %v4704_v47, 1  ;;  %v4298_v62 = vld [vmem:[%s5468_s4 + $0x2b0] sm:$0xff]  }
  0xef   : > { %481 = vst [vmem:[#allocation2 + $0x20] sm:$0xff] %v469_v3  ;;  %v467_v5 = vsel %vm459_vm5, %v419_v1, 0.0  ;;  %v420_v7 = vmax.f32 %v392_v2, 0.0  ;;  %vm464_vm5 = vcmp.eq.s32.totalorder %v4702_v46, 1 }
  0xf0   : > { %479 = vst [vmem:[#allocation2 + $0x10] sm:$0xff] %v467_v5  ;;  %v470_v8 = vsel %vm462_vm4, %v422_v4, 0.0  ;;  %v4726_v9 = vpack.c.bf16 %v467_v5, %v4328_v29  ;;  %vm642_vm4 = vcmp.eq.s32.totalorder %v4721_v60, 1 }
  0xf1   : > { %482 = vst [vmem:[#allocation2 + $0x28] sm:$0xff] %v470_v8  ;;  %v468_v11 = vsel %vm460_vm3, %v420_v7, 0.0  ;;  %v3688_v12 = vpop.f32.mrb[4].mxu0  ;;  %v4732_v13 = vpack.c.bf16 %v470_v8, %v469_v3  ;;  %vm641_vm3 = vcmp.eq.s32.totalorder %v4723_v0, 1 }
  0xf2   : > { %480 = vst [vmem:[#allocation2 + $0x18] sm:$0xff] %v468_v11  ;;  %v413_v15 = vadd.f32 %v3688_v12, %v3134_v54  ;;  %v404_v16 = vpop.f32.mrb[5].mxu0  ;;  %3706 = vmatprep.mubr.msk.bf16.mxu1 %vm4728_vm13, %v4726_v9  ;;  %v4739_v17 = vpack.c.bf16 %v469_v3, %v468_v11  ;;  %v4744_v19 = vpack.c.bf16 %v468_v11, %v467_v5  ;;  %v4216_v5 = vld [vmem:[%s5468_s4 + $0x28] sm:$0xff]   ;;  %v4218_v11 = vld [vmem:[%s5468_s4 + $0x30] sm:$0xff]   ;;  %v4215_v12 = vld [vmem:[%s5468_s4 + $0x120] sm:$0xff]  }
  0xf3   : > { %v405_v22 = vadd.f32 %v3134_v54, %v404_v16  ;;  %v3689_v6 = vpop.f32.mrb[6].mxu0  ;;  %v4220_v16 = vld [vmem:[%s5468_s4 + $0x38] sm:$0xff]  }
  0xf4   : > { %v425_v23 = vmax.f32 %v413_v15, 0.0  ;;  %v416_v24 = vadd.f32 %v3689_v6, %v3134_v54  ;;  %v407_v25 = vpop.f32.mrb[7].mxu0  ;;  %3707 = vmatmul.mubr.msk.bf16.vlgmr.msra.gmra.mrb[0].mxu1 %vm4749_vm11, %v4739_v17  ;;  %v543_v15 = vpop.permute.xlu0 %542  ;;  %v4219_v6 = vld [vmem:[%s5468_s4 + $0x130] sm:$0xff]  }
  0xf5   : > { %v423_v26 = vmax.f32 %v405_v22, 0.0  ;;  %v408_v27 = vadd.f32 %v3134_v54, %v407_v25  ;;  %3715 = vmatpush3.bf16.msra.mxu1 %v4679_v30  ;;  %vm561_vm12 = vcmp.eq.s32.totalorder %v543_v15, 1  ;;  %v4237_v15 = vld [vmem:[%s5468_s4 + $0x1b8] sm:$0xff]   ;;  %v4313_v54 = vld [vmem:[%s5468_s4 + $0x3e8] sm:$0xff]   ;;  %v3227_v30 = vld [vmem:[%s5469_s5] ss:$0 sm:$0xff] }
  0xf6   : > { %v473_v28 = vsel %vm465_vm6, %v425_v23, 0.0  ;;  %v426_v29 = vmax.f32 %v416_v24, 0.0  ;;  %3716 = vmatprep.subr.bf16.mxu1 %v4208_v18  ;;  %vm4797_vm6 = vmpackc.low %vm728_vm9, %vm727_vm0 }
  0xf7   : > { %485 = vst [vmem:[#allocation2 + $0x40] sm:$0xff] %v473_v28  ;;  %v471_v32 = vsel %vm463_vm15, %v423_v26, 0.0  ;;  %v424_v34 = vmax.f32 %v408_v27, 0.0  ;;  %v4784_v42 = vld [vmem:[#allocation2 + $0xf] sm:$0xff]  ;;  %vm4812_vm9 = vmpackc.low %vm642_vm4, %vm641_vm3  ;;  %vm731_vm15 = vcmp.eq.s32.totalorder %v4716_v53, 1  ;;  %v4213_v53 = vld [vmem:[%s5468_s4 + $0x118] sm:$0xff]  }
  0xf8   : > { %483 = vst [vmem:[#allocation2 + $0x30] sm:$0xff] %v471_v32  ;;  %v4780_v37 = vsel %vm466_vm7, %v426_v29, 0.0  ;;  %v658_v38 = vld [vmem:[#allocation2 + $0x21] sm:$0xff]  ;;  %v4782_v39 = vpack.c.bf16 %v471_v32, %v470_v8  ;;  %v655_v48 = vld [vmem:[#allocation2 + $0x9] sm:$0xff]  ;;  %v3176_v57 = vpack.c.bf16 %v4784_v42, %v487_v35  ;;  %vm4829_vm0 = vmpackc.low %vm730_vm14, %vm729_vm2  ;;  %vm732_vm14 = vcmp.eq.s32.totalorder %v4714_v52, 1  ;;  %v549_v22 = vpop.permute.xlu0 %548 }
  0xf9   : > { %486 = vst [vmem:[#allocation2 + $0x48] sm:$0xff] %v4780_v37  ;;  %v472_v47 = vsel %vm464_vm5, %v424_v34, 0.0  ;;  %v656_v49 = vld [vmem:[#allocation2 + $0x11] sm:$0xff]  ;;  %v657_v50 = vld [vmem:[#allocation2 + $0x19] sm:$0xff]  ;;  %3717 = vmatpush3.bf16.msra.mxu1 %v4208_v18  ;;  %v4791_v51 = vpack.c.bf16 %v4780_v37, %v473_v28  ;;  %vm734_vm5 = vcmp.eq.s32.totalorder %v4734_v14, 1  ;;  %vm733_vm7 = vcmp.eq.s32.totalorder %v4753_v21, 1  ;;  %vm4871_vm4 = vmpackc.low %vm732_vm14, %vm731_vm15  ;;  %v546_v14 = vpop.permute.xlu1 %545 }
  0xfa   : > { %484 = vst [vmem:[#allocation2 + $0x38] sm:$0xff] %v472_v47  ;;  %v3237_v55 = vpack.c.bf16 %v656_v49, %v655_v48  ;;  %v4801_v46 = vpack.c.bf16 %v658_v38, %v657_v50  ;;  %3710 = vmatprep.mubr.msk.bf16.mxu1 %vm4774_vm1, %v4782_v39  ;;  %3718 = vmatprep.subr.bf16.mxu1 %v4210_v31  ;;  %vm4883_vm3 = vmpackc.low %vm734_vm5, %vm733_vm7  ;;  %v4222_v18 = vld [vmem:[%s5468_s4 + $0x80] sm:$0xff]   ;;  %v489_v23 = vld [vmem:[#allocation2 + $0x17] sm:$0xff]  ;;  %vm562_vm2 = vcmp.eq.s32.totalorder %v546_v14, 1  ;;  %vm563_vm14 = vcmp.eq.s32.totalorder %v549_v22, 1 }
  0xfb   : > { %v4806_v56 = vpack.c.bf16 %v473_v28, %v472_v47  ;;  %v4823_v59 = vpack.c.bf16 %v472_v47, %v471_v32  ;;  %v4838_v61 = vpack.c.bf16 %v657_v50, %v656_v49  ;;  %v4914_v24 = vld [vmem:[#allocation2 + $0x1f] sm:$0xff]  ;;  %v4921_v27 = vld [vmem:[#allocation2 + $0x27] sm:$0xff]  ;;  %vm4926_vm15 = vmpackc.low %vm562_vm2, %vm561_vm12 }
  0xfc   : > { %3802 = vmatprep.mubr.msk.bf16.mxu0 %vm4797_vm6, %v3237_v55  ;;  %v4919_v26 = vpack.c.bf16 %v4914_v24, %v489_v23  ;;  %v4224_v28 = vld [vmem:[%s5468_s4 + $0x88] sm:$0xff]   ;;  %v555_v36 = vpop.permute.xlu0 %554  ;;  %v4308_v34 = vld [vmem:[%s5468_s4 + $0x2d8] sm:$0xff]   ;;  %v4307_v50 = vld [vmem:[%s5468_s4 + $0x3d0] sm:$0xff]  }
  0xfd   : > { %3711 = vmatmul.mubr.msk.bf16.gmra.mrb[4].mxu1 %vm4812_vm9, %v4806_v56  ;;  %3803 = vmatmul.mubr.msk.bf16.vlgmr.msra.gmra.mrb[8].mxu0 %vm4829_vm0, %v4801_v46  ;;  %v552_v21 = vpop.permute.xlu1 %551  ;;  %vm565_vm2 = vcmp.eq.s32.totalorder %v555_v36, 1  ;;  %v4225_v55 = vld [vmem:[%s5468_s4 + $0x188] sm:$0xff]   ;;  %v4252_v36 = vld [vmem:[%s5468_s4 + $0xf8] sm:$0xff]  }
  0xfe   : > { %3719 = vmatpush3.bf16.msra.mxu1 %v4210_v31  ;;  %3811 = vmatpush3.bf16.msra.mxu0 %v4691_v33  ;;  %vm564_vm10 = vcmp.eq.s32.totalorder %v552_v21, 1  ;;  %v4221_v31 = vld [vmem:[%s5468_s4 + $0x138] sm:$0xff]   ;;  %v4240_v14 = vld [vmem:[%s5468_s4 + $0xc8] sm:$0xff]  }
  0xff   : > { %3730 = vmatprep.mubr.msk.bf16.mxu1 %vm4842_vm8, %v3176_v57  ;;  %3812 = vmatprep.subr.bf16.mxu0 %v4209_v41  ;;  %v659_v45 = vld [vmem:[#allocation2 + $0x29] sm:$0xff]  ;;  %vm4937_vm5 = vmpackc.low %vm564_vm10, %vm563_vm14  ;;  %v4975_v57 = vpack.c.bf16 %v489_v23, %v4784_v42  ;;  %v4229_v42 = vld [vmem:[%s5468_s4 + $0x198] sm:$0xff]  }
 0x100   : > { %3720 = vmatprep.subr.bf16.mxu1 %v4212_v58  ;;  %v4860_v0 = vld [vmem:[#allocation2 + $0x41] sm:$0xff]  ;;  %v4862_v33 = vpack.c.bf16 %v659_v45, %v658_v38  ;;  %v4916_v25 = vld [vmem:[#allocation2 + $0x2f] sm:$0xff]  ;;  %v4244_v23 = vld [vmem:[%s5468_s4 + $0xd8] sm:$0xff]  }
 0x101   : > { %v660_v1 = vld [vmem:[#allocation2 + $0x31] sm:$0xff]  ;;  %v661_v2 = vld [vmem:[#allocation2 + $0x39] sm:$0xff]  ;;  %v4935_v32 = vpack.c.bf16 %v4916_v25, %v4921_v27  ;;  %v558_v35 = vpop.permute.xlu1 %557  ;;  %v5044_v21 = vld [vmem:[#allocation2 + $0x47] sm:$0xff] }
 0x102   : > { %3721 = vmatpush3.bf16.msra.mxu1 %v4212_v58  ;;  %3813 = vmatpush3.bf16.msra.mxu0 %v4209_v41  ;;  %v4866_v3 = vpack.c.bf16 %v660_v1, %v659_v45  ;;  %v4869_v4 = vpack.c.bf16 %v4860_v0, %v661_v2  ;;  %v4881_v7 = vpack.c.bf16 %v661_v2, %v660_v1  ;;  %v4226_v38 = vld [vmem:[%s5468_s4 + $0x90] sm:$0xff]   ;;  %v4953_v48 = vld [vmem:[#allocation2 + $0x3f] sm:$0xff]  ;;  %vm566_vm7 = vcmp.eq.s32.totalorder %v558_v35, 1  ;;  %v4232_v45 = vld [vmem:[%s5468_s4 + $0xa8] sm:$0xff]  }
 0x103   : > { %3722 = vmatprep.subr.bf16.mxu1 %v4214_v44  ;;  %3814 = vmatprep.subr.bf16.mxu0 %v4211_v63  ;;  %v493_v47 = vld [vmem:[#allocation2 + $0x37] sm:$0xff]  ;;  %vm4958_vm12 = vmpackc.low %vm566_vm7, %vm565_vm2  ;;  %v4230_v58 = vld [vmem:[%s5468_s4 + $0xa0] sm:$0xff]   ;;  %v5048_v22 = vpack.c.bf16 %v5044_v21, %v4953_v48 }
 0x104   : > { %3806 = vmatprep.mubr.msk.bf16.mxu0 %vm4871_vm4, %v4866_v3  ;;  %v4956_v49 = vpack.c.bf16 %v4953_v48, %v493_v47  ;;  %v4228_v41 = vld [vmem:[%s5468_s4 + $0x98] sm:$0xff]   ;;  %v4231_v1 = vld [vmem:[%s5468_s4 + $0x1a0] sm:$0xff]   ;;  %v4256_v48 = vld [vmem:[%s5468_s4 + $0x248] sm:$0xff]  }
 0x105   : > { %3807 = vmatmul.mubr.msk.bf16.gmra.mrb[12].mxu0 %vm4883_vm3, %v4869_v4  ;;  %v4236_v2 = vld [vmem:[%s5468_s4 + $0xb8] sm:$0xff]   ;;  %v4247_v35 = vld [vmem:[%s5468_s4 + $0x1e0] sm:$0xff]  }
 0x106   : > { %3723 = vmatpush3.bf16.msra.mxu1 %v4214_v44  ;;  %3815 = vmatpush3.bf16.msra.mxu0 %v4211_v63  ;;  %v4227_v44 = vld [vmem:[%s5468_s4 + $0x190] sm:$0xff]  }
 0x107   : > { %3826 = vmatprep.mubr.msk.bf16.mxu0 %vm4728_vm13, %v4726_v9  ;;  %3816 = vmatprep.subr.bf16.mxu0 %v4213_v53  ;;  %v4217_v9 = vld [vmem:[%s5468_s4 + $0x128] sm:$0xff]   ;;  %v4234_v63 = vld [vmem:[%s5468_s4 + $0xb0] sm:$0xff]  }
 0x108   : > { %3724 = vmatprep.subr.bf16.mxu1 %v4216_v5 }
 0x10a   : > { %3725 = vmatpush3.bf16.msra.mxu1 %v4216_v5  ;;  %3817 = vmatpush3.bf16.msra.mxu0 %v4213_v53  ;;  %v4233_v53 = vld [vmem:[%s5468_s4 + $0x1a8] sm:$0xff]   ;;  %v4238_v5 = vld [vmem:[%s5468_s4 + $0xc0] sm:$0xff]  }
 0x10b   : > { %3726 = vmatprep.subr.bf16.mxu1 %v4218_v11  ;;  %3818 = vmatprep.subr.bf16.mxu0 %v4215_v12 }
 0x10e   : > { %3727 = vmatpush3.bf16.msra.mxu1 %v4218_v11  ;;  %3819 = vmatpush3.bf16.msra.mxu0 %v4215_v12  ;;  %v4235_v11 = vld [vmem:[%s5468_s4 + $0x1b0] sm:$0xff]   ;;  %v5021_v12 = vpack.c.bf16 %v4921_v27, %v4914_v24  ;;  %v4246_v24 = vld [vmem:[%s5468_s4 + $0xe0] sm:$0xff]   ;;  %v4245_v27 = vld [vmem:[%s5468_s4 + $0x1d8] sm:$0xff]  }
 0x10f   : > { %3728 = vmatprep.subr.bf16.mxu1 %v4220_v16  ;;  %3820 = vmatprep.subr.bf16.mxu0 %v4217_v9 }
 0x112   : > { %3729 = vmatpush3.bf16.msra.mxu1 %v4220_v16  ;;  %3821 = vmatpush3.bf16.msra.mxu0 %v4217_v9  ;;  %v5030_v16 = vpack.c.bf16 %v493_v47, %v4916_v25  ;;  %v4242_v9 = vld [vmem:[%s5468_s4 + $0xd0] sm:$0xff]  }
 0x113   : > { %3738 = vmatprep.subr.bf16.mxu1 %v4222_v18  ;;  %3822 = vmatprep.subr.bf16.mxu0 %v4219_v6  ;;  %v4243_v25 = vld [vmem:[%s5468_s4 + $0x1d0] sm:$0xff]  }
 0x114   : > { %v4251_v47 = vld [vmem:[%s5468_s4 + $0x1f0] sm:$0xff]  }
 0x115   : > { %3731 = vmatmul.mubr.msk.bf16.vlgmr.msra.gmra.mrb[0].mxu1 %vm4926_vm15, %v4919_v26 }
 0x116   : > { %3734 = vmatprep.mubr.msk.bf16.mxu1 %vm4937_vm5, %v4935_v32  ;;  %3739 = vmatpush3.bf16.msra.mxu1 %v4222_v18  ;;  %v4239_v18 = vld [vmem:[%s5468_s4 + $0x1c0] sm:$0xff]  }
 0x117   : > { %3823 = vmatpush3.bf16.msra.mxu0 %v4219_v6  ;;  %3740 = vmatprep.subr.bf16.mxu1 %v4224_v28  ;;  %v4241_v6 = vld [vmem:[%s5468_s4 + $0x1c8] sm:$0xff]  }
 0x118   : > { %3824 = vmatprep.subr.bf16.mxu0 %v4221_v31 }
 0x11a   : > { %3741 = vmatpush3.bf16.msra.mxu1 %v4224_v28  ;;  %v4248_v28 = vld [vmem:[%s5468_s4 + $0xe8] sm:$0xff]  }
 0x11b   : > { %3825 = vmatpush3.bf16.msra.mxu0 %v4221_v31  ;;  %3742 = vmatprep.subr.bf16.mxu1 %v4226_v38  ;;  %v4250_v31 = vld [vmem:[%s5468_s4 + $0xf0] sm:$0xff]  }
 0x11c   : > { %3834 = vmatprep.subr.bf16.mxu0 %v4223_v43 }
 0x11d   : > { %3735 = vmatmul.mubr.msk.bf16.gmra.mrb[4].mxu1 %vm4958_vm12, %v4956_v49 }
 0x11e   : > { %3827 = vmatmul.mubr.msk.bf16.vlgmr.msra.gmra.mrb[8].mxu0 %vm4749_vm11, %v4739_v17  ;;  %3743 = vmatpush3.bf16.msra.mxu1 %v4226_v38  ;;  %v4249_v38 = vld [vmem:[%s5468_s4 + $0x1e8] sm:$0xff]  }
 0x11f   : > { %3830 = vmatprep.mubr.msk.bf16.mxu0 %vm4774_vm1, %v4782_v39  ;;  %3835 = vmatpush3.bf16.msra.mxu0 %v4223_v43  ;;  %v4254_v43 = vld [vmem:[%s5468_s4 + $0x240] sm:$0xff]  }
 0x120   : > { %3836 = vmatprep.subr.bf16.mxu0 %v4225_v55  ;;  %3754 = vmatprep.mubr.msk.bf16.mxu1 %vm4842_vm8, %v4975_v57 }
 0x121   : > { %3744 = vmatprep.subr.bf16.mxu1 %v4228_v41 }
 0x122   : > { %3745 = vmatpush3.bf16.msra.mxu1 %v4228_v41  ;;  %v4258_v41 = vld [vmem:[%s5468_s4 + $0x250] sm:$0xff]  }
 0x123   : > { %3837 = vmatpush3.bf16.msra.mxu0 %v4225_v55  ;;  %3746 = vmatprep.subr.bf16.mxu1 %v4230_v58  ;;  %v4253_v55 = vld [vmem:[%s5468_s4 + $0x1f8] sm:$0xff]  }
 0x124   : > { %3838 = vmatprep.subr.bf16.mxu0 %v4227_v44 }
 0x126   : > { %3831 = vmatmul.mubr.msk.bf16.gmra.mrb[12].mxu0 %vm4812_vm9, %v4806_v56  ;;  %3747 = vmatpush3.bf16.msra.mxu1 %v4230_v58  ;;  %v4255_v58 = vld [vmem:[%s5468_s4 + $0x340] sm:$0xff]  }
 0x127   : > { %3839 = vmatpush3.bf16.msra.mxu0 %v4227_v44  ;;  %3850 = vmatprep.mubr.msk.bf16.mxu0 %vm4728_vm13, %v4744_v19  ;;  %v4257_v44 = vld [vmem:[%s5468_s4 + $0x348] sm:$0xff]  }
 0x128   : > { %3840 = vmatprep.subr.bf16.mxu0 %v4229_v42  ;;  %3748 = vmatprep.subr.bf16.mxu1 %v4232_v45 }
 0x12a   : > { %3749 = vmatpush3.bf16.msra.mxu1 %v4232_v45  ;;  %v4262_v45 = vld [vmem:[%s5468_s4 + $0x260] sm:$0xff]  }
 0x12b   : > { %3841 = vmatpush3.bf16.msra.mxu0 %v4229_v42  ;;  %3750 = vmatprep.subr.bf16.mxu1 %v4234_v63  ;;  %v4260_v42 = vld [vmem:[%s5468_s4 + $0x258] sm:$0xff]  }
 0x12c   : > { %3842 = vmatprep.subr.bf16.mxu0 %v4231_v1 }
 0x12e   : > { %3751 = vmatpush3.bf16.msra.mxu1 %v4234_v63  ;;  %v4259_v63 = vld [vmem:[%s5468_s4 + $0x350] sm:$0xff]  }
 0x12f   : > { %3843 = vmatpush3.bf16.msra.mxu0 %v4231_v1  ;;  %3752 = vmatprep.subr.bf16.mxu1 %v4236_v2  ;;  %v5146_v1 = vld [vmem:[#allocation2 + $0x49] sm:$0xff] }
 0x130   : > { %3844 = vmatprep.subr.bf16.mxu0 %v4233_v53 }
 0x132   : > { %3753 = vmatpush3.bf16.msra.mxu1 %v4236_v2  ;;  %v3306_v2 = vpack.c.bf16 %v5146_v1, %v4860_v0  ;;  %v4266_v0 = vld [vmem:[%s5468_s4 + $0x270] sm:$0xff]  }
 0x133   : > { %3845 = vmatpush3.bf16.msra.mxu0 %v4233_v53  ;;  %3762 = vmatprep.subr.bf16.mxu1 %v4238_v5  ;;  %v4261_v53 = vld [vmem:[%s5468_s4 + $0x358] sm:$0xff]  }
 0x134   : > { %3846 = vmatprep.subr.bf16.mxu0 %v4235_v11 }
 0x135   : > { %3755 = vmatmul.mubr.msk.bf16.vlgmr.msra.gmra.mrb[0].mxu1 %vm4926_vm15, %v5021_v12 }
 0x136   : > { %3758 = vmatprep.mubr.msk.bf16.mxu1 %vm4937_vm5, %v5030_v16  ;;  %3763 = vmatpush3.bf16.msra.mxu1 %v4238_v5  ;;  %v4264_v5 = vld [vmem:[%s5468_s4 + $0x268] sm:$0xff]  }
 0x137   : > { %3847 = vmatpush3.bf16.msra.mxu0 %v4235_v11  ;;  %3764 = vmatprep.subr.bf16.mxu1 %v4240_v14  ;;  %v4263_v11 = vld [vmem:[%s5468_s4 + $0x360] sm:$0xff]  }
 0x138   : > { %3848 = vmatprep.subr.bf16.mxu0 %v4237_v15 }
 0x13a   : > { %3765 = vmatpush3.bf16.msra.mxu1 %v4240_v14  ;;  %v4268_v14 = vld [vmem:[%s5468_s4 + $0x278] sm:$0xff]  }
 0x13b   : > { %3849 = vmatpush3.bf16.msra.mxu0 %v4237_v15  ;;  %3766 = vmatprep.subr.bf16.mxu1 %v4242_v9  ;;  %v4270_v15 = vld [vmem:[%s5468_s4 + $0x200] sm:$0xff]  }
 0x13c   : > { %3858 = vmatprep.subr.bf16.mxu0 %v4239_v18 }
 0x13d   : > { %3759 = vmatmul.mubr.msk.bf16.gmra.mrb[4].mxu1 %vm4958_vm12, %v5048_v22 }
 0x13e   : > { %3851 = vmatmul.mubr.msk.bf16.vlgmr.msra.gmra.mrb[8].mxu0 %vm4749_vm11, %v4732_v13  ;;  %3767 = vmatpush3.bf16.msra.mxu1 %v4242_v9  ;;  %v4267_v9 = vld [vmem:[%s5468_s4 + $0x370] sm:$0xff]  }
 0x13f   : > { %3854 = vmatprep.mubr.msk.bf16.mxu0 %vm4774_vm1, %v4823_v59  ;;  %3859 = vmatpush3.bf16.msra.mxu0 %v4239_v18  ;;  %v4272_v18 = vld [vmem:[%s5468_s4 + $0x208] sm:$0xff]  }
 0x140   : > { %3860 = vmatprep.subr.bf16.mxu0 %v4241_v6  ;;  %3778 = vmatprep.mubr.msk.bf16.mxu1 %vm4728_vm13, %v4744_v19 }
 0x141   : > { %3768 = vmatprep.subr.bf16.mxu1 %v4244_v23 }
 0x142   : > { %3769 = vmatpush3.bf16.msra.mxu1 %v4244_v23  ;;  %v4274_v23 = vld [vmem:[%s5468_s4 + $0x210] sm:$0xff]  }
 0x143   : > { %3861 = vmatpush3.bf16.msra.mxu0 %v4241_v6  ;;  %3770 = vmatprep.subr.bf16.mxu1 %v4246_v24  ;;  %v4269_v6 = vld [vmem:[%s5468_s4 + $0x378] sm:$0xff]  }
 0x144   : > { %3862 = vmatprep.subr.bf16.mxu0 %v4243_v25 }
 0x146   : > { %3855 = vmatmul.mubr.msk.bf16.gmra.mrb[12].mxu0 %vm4812_vm9, %v4791_v51  ;;  %3771 = vmatpush3.bf16.msra.mxu1 %v4246_v24  ;;  %v4271_v24 = vld [vmem:[%s5468_s4 + $0x300] sm:$0xff]  }
 0x147   : > { %3863 = vmatpush3.bf16.msra.mxu0 %v4243_v25  ;;  %3874 = vmatprep.mubr.msk.bf16.mxu0 %vm4797_vm6, %v4838_v61  ;;  %v4273_v25 = vld [vmem:[%s5468_s4 + $0x308] sm:$0xff]  }
 0x148   : > { %3864 = vmatprep.subr.bf16.mxu0 %v4245_v27  ;;  %3772 = vmatprep.subr.bf16.mxu1 %v4248_v28 }
 0x14a   : > { %3773 = vmatpush3.bf16.msra.mxu1 %v4248_v28  ;;  %v4278_v28 = vld [vmem:[%s5468_s4 + $0x220] sm:$0xff]  }
 0x14b   : > { %3865 = vmatpush3.bf16.msra.mxu0 %v4245_v27  ;;  %3774 = vmatprep.subr.bf16.mxu1 %v4250_v31  ;;  %v4276_v27 = vld [vmem:[%s5468_s4 + $0x218] sm:$0xff]  }
 0x14c   : > { %3866 = vmatprep.subr.bf16.mxu0 %v4247_v35 }
 0x14e   : > { %3775 = vmatpush3.bf16.msra.mxu1 %v4250_v31  ;;  %v4275_v31 = vld [vmem:[%s5468_s4 + $0x310] sm:$0xff]  }
 0x14f   : > { %3867 = vmatpush3.bf16.msra.mxu0 %v4247_v35  ;;  %3776 = vmatprep.subr.bf16.mxu1 %v4252_v36  ;;  %v4279_v35 = vld [vmem:[%s5468_s4 + $0x320] sm:$0xff]  }
 0x150   : > { %3868 = vmatprep.subr.bf16.mxu0 %v4249_v38 }
 0x152   : > { %3777 = vmatpush3.bf16.msra.mxu1 %v4252_v36  ;;  %v4284_v36 = vld [vmem:[%s5468_s4 + $0x238] sm:$0xff]  }
 0x153   : > { %3869 = vmatpush3.bf16.msra.mxu0 %v4249_v38  ;;  %3882 = vmatprep.subr.bf16.mxu1 %v4254_v43  ;;  %v4286_v38 = vld [vmem:[%s5468_s4 + $0x280] sm:$0xff]  }
 0x154   : > { %3870 = vmatprep.subr.bf16.mxu0 %v4251_v47 }
 0x155   : > { %3779 = vmatmul.mubr.msk.bf16.vlgmr.msra.gmra.mrb[0].mxu1 %vm4749_vm11, %v4732_v13 }
 0x156   : > { %3782 = vmatprep.mubr.msk.bf16.mxu1 %vm4774_vm1, %v4823_v59  ;;  %3883 = vmatpush3.bf16.msra.mxu1 %v4254_v43  ;;  %v4283_v43 = vld [vmem:[%s5468_s4 + $0x330] sm:$0xff]  }
 0x157   : > { %3871 = vmatpush3.bf16.msra.mxu0 %v4251_v47  ;;  %3884 = vmatprep.subr.bf16.mxu1 %v4256_v48  ;;  %v4288_v47 = vld [vmem:[%s5468_s4 + $0x288] sm:$0xff]  }
 0x158   : > { %3872 = vmatprep.subr.bf16.mxu0 %v4253_v55 }
 0x15a   : > { %3885 = vmatpush3.bf16.msra.mxu1 %v4256_v48  ;;  %v4285_v48 = vld [vmem:[%s5468_s4 + $0x338] sm:$0xff]  }
 0x15b   : > { %3873 = vmatpush3.bf16.msra.mxu0 %v4253_v55  ;;  %3886 = vmatprep.subr.bf16.mxu1 %v4258_v41  ;;  %v4290_v55 = vld [vmem:[%s5468_s4 + $0x290] sm:$0xff]  }
 0x15c   : > { %3978 = vmatprep.subr.bf16.mxu0 %v4255_v58 }
 0x15d   : > { %3783 = vmatmul.mubr.msk.bf16.gmra.mrb[4].mxu1 %vm4812_vm9, %v4791_v51 }
 0x15e   : > { %3875 = vmatmul.mubr.msk.bf16.vlgmr.msra.gmra.mrb[8].mxu0 %vm4829_vm0, %v4862_v33  ;;  %3887 = vmatpush3.bf16.msra.mxu1 %v4258_v41  ;;  %v4287_v41 = vld [vmem:[%s5468_s4 + $0x380] sm:$0xff]  }
 0x15f   : > { %3878 = vmatprep.mubr.msk.bf16.mxu0 %vm4871_vm4, %v4881_v7  ;;  %3979 = vmatpush3.bf16.msra.mxu0 %v4255_v58  ;;  %v4294_v58 = vld [vmem:[%s5468_s4 + $0x2a0] sm:$0xff]  }
 0x160   : > { %3980 = vmatprep.subr.bf16.mxu0 %v4257_v44  ;;  %3898 = vmatprep.mubr.msk.bf16.mxu1 %vm4728_vm13, %v4744_v19 }
 0x161   : > { %3888 = vmatprep.subr.bf16.mxu1 %v4260_v42 }
 0x162   : > { %3889 = vmatpush3.bf16.msra.mxu1 %v4260_v42  ;;  %v4302_v42 = vld [vmem:[%s5468_s4 + $0x2c0] sm:$0xff]  }
 0x163   : > { %3981 = vmatpush3.bf16.msra.mxu0 %v4257_v44  ;;  %3890 = vmatprep.subr.bf16.mxu1 %v4262_v45  ;;  %v4297_v44 = vld [vmem:[%s5468_s4 + $0x3a8] sm:$0xff]  }
 0x164   : > { %3982 = vmatprep.subr.bf16.mxu0 %v4259_v63 }
 0x166   : > { %3879 = vmatmul.mubr.msk.bf16.gmra.mrb[12].mxu0 %vm4883_vm3, %v3306_v2  ;;  %3891 = vmatpush3.bf16.msra.mxu1 %v4262_v45  ;;  %v4299_v45 = vld [vmem:[%s5468_s4 + $0x3b0] sm:$0xff]  }
 0x167   : > { %3983 = vmatpush3.bf16.msra.mxu0 %v4259_v63  ;;  %3994 = vmatprep.mubr.msk.bf16.mxu0 %vm4797_vm6, %v4838_v61  ;;  %v4265_v61 = vld [vmem:[%s5468_s4 + $0x368] sm:$0xff]  }
 0x168   : > { %3984 = vmatprep.subr.bf16.mxu0 %v4261_v53  ;;  %3892 = vmatprep.subr.bf16.mxu1 %v4264_v5  ;;  %v4304_v63 = vld [vmem:[%s5468_s4 + $0x2c8] sm:$0xff]  }
 0x16a   : > { %3893 = vmatpush3.bf16.msra.mxu1 %v4264_v5  ;;  %v4303_v5 = vld [vmem:[%s5468_s4 + $0x3c0] sm:$0xff]  }
 0x16b   : > { %3985 = vmatpush3.bf16.msra.mxu0 %v4261_v53  ;;  %3894 = vmatprep.subr.bf16.mxu1 %v4266_v0  ;;  %v4306_v53 = vld [vmem:[%s5468_s4 + $0x2d0] sm:$0xff]  }
 0x16c   : > { %3986 = vmatprep.subr.bf16.mxu0 %v4263_v11 }
 0x16e   : > { %3895 = vmatpush3.bf16.msra.mxu1 %v4266_v0  ;;  %v807_v0 = vld [vmem:[#allocation2 + $0x4f] sm:$0xff] }
 0x16f   : > { %3987 = vmatpush3.bf16.msra.mxu0 %v4263_v11  ;;  %3896 = vmatprep.subr.bf16.mxu1 %v4268_v14  ;;  %v3367_v29 = vpack.c.bf16 %v807_v0, %v5044_v21  ;;  %v4318_v21 = vld [vmem:[#allocation2 + $0x8] sm:$0xff] }
 0x170   : > { %3988 = vmatprep.subr.bf16.mxu0 %v4265_v61  ;;  %v3387_v11 = vpack.c.bf16 %v4318_v21, %v4780_v37  ;;  %v4311_v37 = vld [vmem:[%s5468_s4 + $0x3e0] sm:$0xff]  }
 0x172   : > { %3897 = vmatpush3.bf16.msra.mxu1 %v4268_v14  ;;  %v4309_v14 = vld [vmem:[%s5468_s4 + $0x3d8] sm:$0xff]  }
 0x173   : > { %3989 = vmatpush3.bf16.msra.mxu0 %v4265_v61  ;;  %3906 = vmatprep.subr.bf16.mxu1 %v4270_v15  ;;  %v4316_v61 = vld [vmem:[%s5468_s4 + $0x2f8] sm:$0xff]  }
 0x174   : > { %3990 = vmatprep.subr.bf16.mxu0 %v4267_v9 }
 0x175   : > { %3899 = vmatmul.mubr.msk.bf16.vlgmr.msra.gmra.mrb[8].mxu1 %vm4749_vm11, %v4732_v13 }
 0x176   : > { %3902 = vmatprep.mubr.msk.bf16.mxu1 %vm4774_vm1, %v4823_v59  ;;  %3907 = vmatpush3.bf16.msra.mxu1 %v4270_v15  ;;  %v4317_v15 = vld [vmem:[%s5468_s4 + $0x3f8] sm:$0xff]  }
 0x177   : > { %3991 = vmatpush3.bf16.msra.mxu0 %v4267_v9  ;;  %3908 = vmatprep.subr.bf16.mxu1 %v4272_v18  ;;  %v3308_v9 = vld [vmem:[%s5469_s5 + $0x1] ss:$0 sm:$0xff] }
 0x178   : > { %3992 = vmatprep.subr.bf16.mxu0 %v4269_v6 }
 0x17a   : > { %3909 = vmatpush3.bf16.msra.mxu1 %v4272_v18 }
 0x17b   : > { %3993 = vmatpush3.bf16.msra.mxu0 %v4269_v6  ;;  %3910 = vmatprep.subr.bf16.mxu1 %v4274_v23 }
 0x17c   : > { %4002 = vmatprep.subr.bf16.mxu0 %v4271_v24 }
 0x17d   : > { %3903 = vmatmul.mubr.msk.bf16.gmra.mrb[12].mxu1 %vm4812_vm9, %v4791_v51 }
 0x17e   : > { %3995 = vmatmul.mubr.msk.bf16.vlgmr.msra.gmra.mrb[16].mxu0 %vm4829_vm0, %v4862_v33  ;;  %3911 = vmatpush3.bf16.msra.mxu1 %v4274_v23  ;;  %v4277_v33 = vld [vmem:[%s5468_s4 + $0x318] sm:$0xff]  }
 0x17f   : > { %3998 = vmatprep.mubr.msk.bf16.mxu0 %vm4871_vm4, %v4881_v7  ;;  %4003 = vmatpush3.bf16.msra.mxu0 %v4271_v24  ;;  %v4280_v7 = vld [vmem:[%s5468_s4 + $0x228] sm:$0xff]  }
 0x180   : > { %4004 = vmatprep.subr.bf16.mxu0 %v4273_v25  ;;  %3922 = vmatprep.mubr.msk.bf16.mxu1 %vm4842_vm8, %v4975_v57  ;;  %v4282_v57 = vld [vmem:[%s5468_s4 + $0x230] sm:$0xff]  }
 0x181   : > { %3912 = vmatprep.subr.bf16.mxu1 %v4276_v27 }
 0x182   : > { %3913 = vmatpush3.bf16.msra.mxu1 %v4276_v27 }
 0x183   : > { %4005 = vmatpush3.bf16.msra.mxu0 %v4273_v25  ;;  %3914 = vmatprep.subr.bf16.mxu1 %v4278_v28 }
 0x184   : > { %4006 = vmatprep.subr.bf16.mxu0 %v4275_v31 }
 0x186   : > { %3999 = vmatmul.mubr.msk.bf16.gmra.mrb[20].mxu0 %vm4883_vm3, %v3306_v2  ;;  %3915 = vmatpush3.bf16.msra.mxu1 %v4278_v28  ;;  %v4301_v2 = vld [vmem:[%s5468_s4 + $0x3b8] sm:$0xff]  }
 0x187   : > { %4007 = vmatpush3.bf16.msra.mxu0 %v4275_v31  ;;  %4018 = vmatprep.mubr.msk.bf16.mxu0 %vm4728_vm13, %v4744_v19  ;;  %v4281_v19 = vld [vmem:[%s5468_s4 + $0x328] sm:$0xff]  }
 0x188   : > { %4008 = vmatprep.subr.bf16.mxu0 %v4277_v33  ;;  %3916 = vmatprep.subr.bf16.mxu1 %v4280_v7 }
 0x18a   : > { %3917 = vmatpush3.bf16.msra.mxu1 %v4280_v7 }
 0x18b   : > { %4009 = vmatpush3.bf16.msra.mxu0 %v4277_v33  ;;  %3918 = vmatprep.subr.bf16.mxu1 %v4282_v57 }
 0x18c   : > { %4010 = vmatprep.subr.bf16.mxu0 %v4279_v35 }
 0x18e   : > { %3919 = vmatpush3.bf16.msra.mxu1 %v4282_v57 }
 0x18f   : > { %4011 = vmatpush3.bf16.msra.mxu0 %v4279_v35  ;;  %3920 = vmatprep.subr.bf16.mxu1 %v4284_v36 }
 0x190   : > { %4012 = vmatprep.subr.bf16.mxu0 %v4281_v19 }
 0x192   : > { %3921 = vmatpush3.bf16.msra.mxu1 %v4284_v36 }
 0x193   : > { %4013 = vmatpush3.bf16.msra.mxu0 %v4281_v19  ;;  %3930 = vmatprep.subr.bf16.mxu1 %v4286_v38 }
 0x194   : > { %4014 = vmatprep.subr.bf16.mxu0 %v4283_v43 }
 0x195   : > { %3923 = vmatmul.mubr.msk.bf16.vlgmr.msra.gmra.mrb[8].mxu1 %vm4926_vm15, %v5021_v12  ;;  %v4289_v12 = vld [vmem:[%s5468_s4 + $0x388] sm:$0xff]  }
 0x196   : > { %3926 = vmatprep.mubr.msk.bf16.mxu1 %vm4937_vm5, %v5030_v16  ;;  %3931 = vmatpush3.bf16.msra.mxu1 %v4286_v38  ;;  %v4292_v16 = vld [vmem:[%s5468_s4 + $0x298] sm:$0xff]  }
 0x197   : > { %4015 = vmatpush3.bf16.msra.mxu0 %v4283_v43  ;;  %3932 = vmatprep.subr.bf16.mxu1 %v4288_v47 }
 0x198   : > { %4016 = vmatprep.subr.bf16.mxu0 %v4285_v48 }
 0x19a   : > { %3933 = vmatpush3.bf16.msra.mxu1 %v4288_v47 }
 0x19b   : > { %4017 = vmatpush3.bf16.msra.mxu0 %v4285_v48  ;;  %3934 = vmatprep.subr.bf16.mxu1 %v4290_v55 }
 0x19c   : > { %4026 = vmatprep.subr.bf16.mxu0 %v4287_v41 }
 0x19d   : > { %3927 = vmatmul.mubr.msk.bf16.gmra.mrb[12].mxu1 %vm4958_vm12, %v5048_v22  ;;  %v4291_v22 = vld [vmem:[%s5468_s4 + $0x390] sm:$0xff]  }
 0x19e   : > { %4019 = vmatmul.mubr.msk.bf16.vlgmr.msra.gmra.mrb[16].mxu0 %vm4749_vm11, %v4732_v13  ;;  %3935 = vmatpush3.bf16.msra.mxu1 %v4290_v55  ;;  %v4293_v13 = vld [vmem:[%s5468_s4 + $0x398] sm:$0xff]  }
 0x19f   : > { %4022 = vmatprep.mubr.msk.bf16.mxu0 %vm4774_vm1, %v4823_v59  ;;  %4027 = vmatpush3.bf16.msra.mxu0 %v4287_v41  ;;  %v4296_v59 = vld [vmem:[%s5468_s4 + $0x2a8] sm:$0xff]  }
 0x1a0   : > { %4028 = vmatprep.subr.bf16.mxu0 %v4289_v12  ;;  %3946 = vmatprep.mubr.msk.bf16.mxu1 %vm4842_vm8, %v4919_v26  ;;  %v4295_v26 = vld [vmem:[%s5468_s4 + $0x3a0] sm:$0xff]  }
 0x1a1   : > { %3936 = vmatprep.subr.bf16.mxu1 %v4292_v16 }
 0x1a2   : > { %3937 = vmatpush3.bf16.msra.mxu1 %v4292_v16 }
 0x1a3   : > { %4029 = vmatpush3.bf16.msra.mxu0 %v4289_v12  ;;  %3938 = vmatprep.subr.bf16.mxu1 %v4294_v58 }
 0x1a4   : > { %4030 = vmatprep.subr.bf16.mxu0 %v4291_v22 }
 0x1a6   : > { %4023 = vmatmul.mubr.msk.bf16.gmra.mrb[20].mxu0 %vm4812_vm9, %v4791_v51  ;;  %3939 = vmatpush3.bf16.msra.mxu1 %v4294_v58  ;;  %v4300_v51 = vld [vmem:[%s5468_s4 + $0x2b8] sm:$0xff]  }
 0x1a7   : > { %4031 = vmatpush3.bf16.msra.mxu0 %v4291_v22  ;;  %4042 = vmatprep.mubr.msk.bf16.mxu0 %vm4728_vm13, %v4739_v17 }
 0x1a8   : > { %4032 = vmatprep.subr.bf16.mxu0 %v4293_v13  ;;  %3940 = vmatprep.subr.bf16.mxu1 %v4296_v59 }
 0x1aa   : > { %3941 = vmatpush3.bf16.msra.mxu1 %v4296_v59 }
 0x1ab   : > { %4033 = vmatpush3.bf16.msra.mxu0 %v4293_v13  ;;  %3942 = vmatprep.subr.bf16.mxu1 %v4298_v62  ;;  %v3389_v13 = vld [vmem:[%s5469_s5 + $0x2] ss:$0 sm:$0xff] }
 0x1ac   : > { %4034 = vmatprep.subr.bf16.mxu0 %v4295_v26 }
 0x1ae   : > { %3943 = vmatpush3.bf16.msra.mxu1 %v4298_v62 }
 0x1af   : > { %4035 = vmatpush3.bf16.msra.mxu0 %v4295_v26  ;;  %3944 = vmatprep.subr.bf16.mxu1 %v4300_v51 }
 0x1b0   : > { %4036 = vmatprep.subr.bf16.mxu0 %v4297_v44 }
 0x1b2   : > { %3945 = vmatpush3.bf16.msra.mxu1 %v4300_v51 }
 0x1b3   : > { %4037 = vmatpush3.bf16.msra.mxu0 %v4297_v44  ;;  %3954 = vmatprep.subr.bf16.mxu1 %v4302_v42 }
 0x1b4   : > { %4038 = vmatprep.subr.bf16.mxu0 %v4299_v45 }
 0x1b5   : > { %3947 = vmatmul.mubr.msk.bf16.vlgmr.msra.gmra.mrb[8].mxu1 %vm4926_vm15, %v4935_v32  ;;  %v4305_v32 = vld [vmem:[%s5468_s4 + $0x3c8] sm:$0xff]  }
 0x1b6   : > { %3950 = vmatprep.mubr.msk.bf16.mxu1 %vm4937_vm5, %v4956_v49  ;;  %3955 = vmatpush3.bf16.msra.mxu1 %v4302_v42  ;;  %v4310_v49 = vld [vmem:[%s5468_s4 + $0x2e0] sm:$0xff]  }
 0x1b7   : > { %4039 = vmatpush3.bf16.msra.mxu0 %v4299_v45  ;;  %3956 = vmatprep.subr.bf16.mxu1 %v4304_v63 }
 0x1b8   : > { %4040 = vmatprep.subr.bf16.mxu0 %v4301_v2 }
 0x1ba   : > { %3957 = vmatpush3.bf16.msra.mxu1 %v4304_v63 }
 0x1bb   : > { %4041 = vmatpush3.bf16.msra.mxu0 %v4301_v2  ;;  %3958 = vmatprep.subr.bf16.mxu1 %v4306_v53  ;;  %v3470_v2 = vld [vmem:[%s5469_s5 + $0x3] ss:$0 sm:$0xff] }
 0x1bc   : > { %4050 = vmatprep.subr.bf16.mxu0 %v4303_v5 }
 0x1bd   : > { %3951 = vmatmul.mubr.msk.bf16.gmra.mrb[12].mxu1 %vm4958_vm12, %v3367_v29 }
 0x1be   : > { %4043 = vmatmul.mubr.msk.bf16.vlgmr.msra.gmra.mrb[16].mxu0 %vm4749_vm11, %v4782_v39  ;;  %3959 = vmatpush3.bf16.msra.mxu1 %v4306_v53 }
 0x1bf   : > { %4046 = vmatprep.mubr.msk.bf16.mxu0 %vm4774_vm1, %v4806_v56  ;;  %4051 = vmatpush3.bf16.msra.mxu0 %v4303_v5 }
 0x1c0   : > { %4052 = vmatprep.subr.bf16.mxu0 %v4305_v32  ;;  %3970 = vmatprep.mubr.msk.bf16.mxu1 %vm4728_vm13, %v4739_v17  ;;  %v4314_v17 = vld [vmem:[%s5468_s4 + $0x2f0] sm:$0xff]  }
 0x1c1   : > { %3960 = vmatprep.subr.bf16.mxu1 %v4308_v34 }
 0x1c2   : > { %3961 = vmatpush3.bf16.msra.mxu1 %v4308_v34 }
 0x1c3   : > { %4053 = vmatpush3.bf16.msra.mxu0 %v4305_v32  ;;  %3962 = vmatprep.subr.bf16.mxu1 %v4310_v49 }
 0x1c4   : > { %4054 = vmatprep.subr.bf16.mxu0 %v4307_v50 }
 0x1c6   : > { %4047 = vmatmul.mubr.msk.bf16.gmra.mrb[20].mxu0 %vm4812_vm9, %v3387_v11  ;;  %3963 = vmatpush3.bf16.msra.mxu1 %v4310_v49 }
 0x1c7   : > { %4055 = vmatpush3.bf16.msra.mxu0 %v4307_v50  ;;  %4066 = vmatprep.mubr.msk.bf16.mxu0 %vm4797_vm6, %v4801_v46  ;;  %v4315_v46 = vld [vmem:[%s5468_s4 + $0x3f0] sm:$0xff]  }
 0x1c8   : > { %4056 = vmatprep.subr.bf16.mxu0 %v4309_v14  ;;  %3964 = vmatprep.subr.bf16.mxu1 %v4312_v10 }
 0x1ca   : > { %3965 = vmatpush3.bf16.msra.mxu1 %v4312_v10 }
 0x1cb   : > { %4057 = vmatpush3.bf16.msra.mxu0 %v4309_v14  ;;  %3966 = vmatprep.subr.bf16.mxu1 %v4314_v17 }
 0x1cc   : > { %4058 = vmatprep.subr.bf16.mxu0 %v4311_v37 }
 0x1ce   : > { %3967 = vmatpush3.bf16.msra.mxu1 %v4314_v17 }
 0x1cf   : > { %4059 = vmatpush3.bf16.msra.mxu0 %v4311_v37  ;;  %3968 = vmatprep.subr.bf16.mxu1 %v4316_v61 }
 0x1d0   : > { %4060 = vmatprep.subr.bf16.mxu0 %v4313_v54 }
 0x1d2   : > { %3969 = vmatpush3.bf16.msra.mxu1 %v4316_v61 }
 0x1d3   : > { %4061 = vmatpush3.bf16.msra.mxu0 %v4313_v54 }
 0x1d4   : > { %4062 = vmatprep.subr.bf16.mxu0 %v4315_v46 }
 0x1d5   : > { %3971 = vmatmul.mubr.msk.bf16.vlgmr.msra.gmra.mrb[8].mxu1 %vm4749_vm11, %v4782_v39  ;;  %v3468_v39 = vpack.c.bf16 %v833_v20, %v5146_v1 }
 0x1d6   : > { %3974 = vmatprep.mubr.msk.bf16.mxu1 %vm4774_vm1, %v4806_v56 }
 0x1d7   : > { %4063 = vmatpush3.bf16.msra.mxu0 %v4315_v46 }
 0x1d8   : > { %4064 = vmatprep.subr.bf16.mxu0 %v4317_v15 }
 0x1db   : > { %4065 = vmatpush3.bf16.msra.mxu0 %v4317_v15 }
 0x1dd   : > { %3975 = vmatmul.mubr.msk.bf16.gmra.mrb[12].mxu1 %vm4812_vm9, %v3387_v11 }
 0x1de   : > { %4067 = vmatmul.mubr.msk.bf16.vlgmr.msra.gmra.mrb[16].mxu0 %vm4829_vm0, %v4866_v3 }
 0x1df   : > { %4070 = vmatprep.mubr.msk.bf16.mxu0 %vm4871_vm4, %v4869_v4 }
 0x1e6   : > { %4071 = vmatmul.mubr.msk.bf16.gmra.mrb[20].mxu0 %vm4883_vm3, %v3468_v39 }
 0x228   : > { %v3780_v56 = vpop.f32.mrb[0].mxu1 }
 0x229   : > { %v1387_v40 = vadd.f32 %v3780_v56, %v3227_v30  ;;  %v1339_v60 = vpop.f32.mrb[1].mxu1 }
 0x22a   : > { %v1385_v3 = vadd.f32 %v3227_v30, %v1339_v60  ;;  %v3781_v4 = vpop.f32.mrb[2].mxu1 }
 0x22b   : > { %1395 = vst [vmem:[%s5418_s29 + $0x40] sm:$0xff] %v1387_v40  ;;  %v1388_v52 = vadd.f32 %v3781_v4, %v3227_v30  ;;  %v1342_v8 = vpop.f32.mrb[3].mxu1 }
 0x22c   : > { %1393 = vst [vmem:[%s5418_s29] sm:$0xff] %v1385_v3  ;;  %v1386_v1 = vadd.f32 %v3227_v30, %v1342_v8 }
 0x22d   : > { %1396 = vst [vmem:[%s5418_s29 + $0x60] sm:$0xff] %v1388_v52 }
 0x22e   : > { %1394 = vst [vmem:[%s5418_s29 + $0x20] sm:$0xff] %v1386_v1 }
 0x230   : > { %v3784_v18 = vpop.f32.mrb[4].mxu1 }
 0x231   : > { %v3876_v6 = vpop.f32.mrb[8].mxu0  ;;  %v1391_v23 = vadd.f32 %v3784_v18, %v3227_v30  ;;  %v1355_v24 = vpop.f32.mrb[5].mxu1 }
 0x232   : > { %v1942_v25 = vadd.f32 %v3876_v6, %v3308_v9  ;;  %v1894_v27 = vpop.f32.mrb[9].mxu0  ;;  %v1389_v28 = vadd.f32 %v3227_v30, %v1355_v24  ;;  %v3785_v31 = vpop.f32.mrb[6].mxu1 }
 0x233   : > { %v1940_v33 = vadd.f32 %v3308_v9, %v1894_v27  ;;  %v3877_v7 = vpop.f32.mrb[10].mxu0  ;;  %1399 = vst [vmem:[%s5418_s29 + $0xc0] sm:$0xff] %v1391_v23  ;;  %v1392_v57 = vadd.f32 %v3785_v31, %v3227_v30  ;;  %v1358_v35 = vpop.f32.mrb[7].mxu1 }
 0x234   : > { %1950 = vst [vmem:[%s5418_s29 + $0x48] sm:$0xff] %v1942_v25  ;;  %v1943_v36 = vadd.f32 %v3877_v7, %v3308_v9  ;;  %v1897_v19 = vpop.f32.mrb[11].mxu0  ;;  %1397 = vst [vmem:[%s5418_s29 + $0x80] sm:$0xff] %v1389_v28  ;;  %v1390_v38 = vadd.f32 %v3227_v30, %v1358_v35 }
 0x235   : > { %1948 = vst [vmem:[%s5418_s29 + $0x8] sm:$0xff] %v1940_v33  ;;  %v1941_v43 = vadd.f32 %v3308_v9, %v1897_v19  ;;  %1400 = vst [vmem:[%s5418_s29 + $0xe0] sm:$0xff] %v1392_v57 }
 0x236   : > { %1951 = vst [vmem:[%s5418_s29 + $0x68] sm:$0xff] %v1943_v36  ;;  %1398 = vst [vmem:[%s5418_s29 + $0xa0] sm:$0xff] %v1390_v38 }
 0x237   : > { %1949 = vst [vmem:[%s5418_s29 + $0x28] sm:$0xff] %v1941_v43 }
 0x239   : > { %v3880_v47 = vpop.f32.mrb[12].mxu0 }
 0x23a   : > { %v1946_v48 = vadd.f32 %v3880_v47, %v3308_v9  ;;  %v1910_v55 = vpop.f32.mrb[13].mxu0 }
 0x23b   : > { %v1944_v41 = vadd.f32 %v3308_v9, %v1910_v55  ;;  %v3881_v12 = vpop.f32.mrb[14].mxu0 }
 0x23c   : > { %1954 = vst [vmem:[%s5418_s29 + $0xc8] sm:$0xff] %v1946_v48  ;;  %v1947_v16 = vadd.f32 %v3881_v12, %v3308_v9  ;;  %v1913_v58 = vpop.f32.mrb[15].mxu0 }
 0x23d   : > { %1952 = vst [vmem:[%s5418_s29 + $0x88] sm:$0xff] %v1944_v41  ;;  %v1945_v22 = vadd.f32 %v3308_v9, %v1913_v58 }
 0x23e   : > { %1955 = vst [vmem:[%s5418_s29 + $0xe8] sm:$0xff] %v1947_v16 }
 0x23f   : > { %1953 = vst [vmem:[%s5418_s29 + $0xa8] sm:$0xff] %v1945_v22 }
 0x2a8   : > { %v3972_v59 = vpop.f32.mrb[8].mxu1 }
 0x2a9   : > { %v2497_v62 = vadd.f32 %v3972_v59, %v3389_v13  ;;  %v2449_v26 = vpop.f32.mrb[9].mxu1 }
 0x2aa   : > { %v2495_v51 = vadd.f32 %v3389_v13, %v2449_v26  ;;  %v3973_v44 = vpop.f32.mrb[10].mxu1 }
 0x2ab   : > { %2505 = vst [vmem:[%s5418_s29 + $0x50] sm:$0xff] %v2497_v62  ;;  %v2498_v42 = vadd.f32 %v3973_v44, %v3389_v13  ;;  %v2452_v45 = vpop.f32.mrb[11].mxu1 }
 0x2ac   : > { %2503 = vst [vmem:[%s5418_s29 + $0x10] sm:$0xff] %v2495_v51  ;;  %v2496_v63 = vadd.f32 %v3389_v13, %v2452_v45 }
 0x2ad   : > { %2506 = vst [vmem:[%s5418_s29 + $0x70] sm:$0xff] %v2498_v42 }
 0x2ae   : > { %2504 = vst [vmem:[%s5418_s29 + $0x30] sm:$0xff] %v2496_v63 }
 0x2b0   : > { %v3976_v53 = vpop.f32.mrb[12].mxu1 }
 0x2b1   : > { %v4068_v5 = vpop.f32.mrb[16].mxu0  ;;  %v2501_v0 = vadd.f32 %v3976_v53, %v3389_v13  ;;  %v2465_v29 = vpop.f32.mrb[13].mxu1 }
 0x2b2   : > { %v3052_v32 = vadd.f32 %v4068_v5, %v3470_v2  ;;  %v3004_v34 = vpop.f32.mrb[17].mxu0  ;;  %v2499_v49 = vadd.f32 %v3389_v13, %v2465_v29  ;;  %v3977_v50 = vpop.f32.mrb[14].mxu1 }
 0x2b3   : > { %v3050_v21 = vadd.f32 %v3470_v2, %v3004_v34  ;;  %v4069_v11 = vpop.f32.mrb[18].mxu0  ;;  %2509 = vst [vmem:[%s5418_s29 + $0xd0] sm:$0xff] %v2501_v0  ;;  %v2502_v14 = vadd.f32 %v3977_v50, %v3389_v13  ;;  %v2468_v10 = vpop.f32.mrb[15].mxu1 }
 0x2b4   : > { %3060 = vst [vmem:[%s5418_s29 + $0x58] sm:$0xff] %v3052_v32  ;;  %v3053_v17 = vadd.f32 %v4069_v11, %v3470_v2  ;;  %v3007_v37 = vpop.f32.mrb[19].mxu0  ;;  %2507 = vst [vmem:[%s5418_s29 + $0x90] sm:$0xff] %v2499_v49  ;;  %v2500_v61 = vadd.f32 %v3389_v13, %v2468_v10 }
 0x2b5   : > { %3058 = vst [vmem:[%s5418_s29 + $0x18] sm:$0xff] %v3050_v21  ;;  %v3051_v54 = vadd.f32 %v3470_v2, %v3007_v37  ;;  %2510 = vst [vmem:[%s5418_s29 + $0xf0] sm:$0xff] %v2502_v14 }
 0x2b6   : > { %3061 = vst [vmem:[%s5418_s29 + $0x78] sm:$0xff] %v3053_v17  ;;  %2508 = vst [vmem:[%s5418_s29 + $0xb0] sm:$0xff] %v2500_v61 }
 0x2b7   : > { %3059 = vst [vmem:[%s5418_s29 + $0x38] sm:$0xff] %v3051_v54 }
 0x2b9   : > { %v4072_v46 = vpop.f32.mrb[20].mxu0 }
 0x2ba   : > { %v3056_v15 = vadd.f32 %v4072_v46, %v3470_v2  ;;  %v3020_v20 = vpop.f32.mrb[21].mxu0 }
 0x2bb   : > { %v3054_v39 = vadd.f32 %v3470_v2, %v3020_v20  ;;  %v4073_v30 = vpop.f32.mrb[22].mxu0 }
 0x2bc   : > { %3064 = vst [vmem:[%s5418_s29 + $0xd8] sm:$0xff] %v3056_v15  ;;  %v3057_v56 = vadd.f32 %v4073_v30, %v3470_v2  ;;  %v3023_v40 = vpop.f32.mrb[23].mxu0 }
 0x2bd   : > { %3062 = vst [vmem:[%s5418_s29 + $0x98] sm:$0xff] %v3054_v39  ;;  %v3055_v60 = vadd.f32 %v3470_v2, %v3023_v40 }
 0x2be   : > { %3065 = vst [vmem:[%s5418_s29 + $0xf8] sm:$0xff] %v3057_v56 }
 0x2bf   : > { %3063 = vst [vmem:[%s5418_s29 + $0xb8] sm:$0xff] %v3055_v60 }
 0x2c0 PF: > { %s16_s21 = sadd.s32 1, %s4325_s21  }
 0x2c1   : > { %p13_p4 = scmp.ge.s32.totalorder %s16_s21, 4  }
 0x2c3   :  { %15 = sbr.rel (!%p13_p4) target bundleno = 1 (0x1), region = 74 }

</bundles_post_ra>
